<compile_context>
chip_gen: v5e
topology: v5e:2x2
jax: 0.10.0
libtpu: 0.0.40
codegen_flags: <defaults>
</compile_context>

<pallas_src>
import functools

import jax
import jax.numpy as jnp
from jax.experimental import pallas as pl
from jax.experimental.pallas import tpu as pltpu


# ----------------------------- kernels --------------------------------------


def _matmul_and_stats(p_ref, w_ref):
    """MXU matmul of one M-tile + per-channel sum / sum-of-squares partials.

    Padded M rows of the patch matrix are exact zeros, so they contribute
    exactly zero to both sums -> no row masking is needed for the BN stats
    (the host divides by the true M).
    """
    y = jnp.dot(p_ref[...], w_ref[...], preferred_element_type=jnp.float32)
    s = jnp.sum(y, axis=0, keepdims=True)          # (1, Cp)
    q = jnp.sum(y * y, axis=0, keepdims=True)      # (1, Cp)
    return y, jnp.concatenate([s, q], axis=0)[None]  # (1, 2, Cp)


def _conv_stats_kernel(p_ref, w_ref, part_ref):
    """Pass 1 (recompute variant): conv matmul + per-tile partial stats."""
    _, part = _matmul_and_stats(p_ref, w_ref)
    part_ref[...] = part


def _conv_stats_store_kernel(p_ref, w_ref, part_ref, y_ref):
    """Pass 1 (stored variant): also write the bf16 conv result for pass 2."""
    y, part = _matmul_and_stats(p_ref, w_ref)
    part_ref[...] = part
    y_ref[...] = y.astype(y_ref.dtype)


def _bn_lrelu_matmul_kernel(p_ref, w_ref, scale_ref, shift_ref, o_ref):
    """Pass 2 (recompute variant): redo conv matmul, fused BN affine + LeakyReLU."""
    y = jnp.dot(p_ref[...], w_ref[...], preferred_element_type=jnp.float32)
    z = y * scale_ref[...] + shift_ref[...]          # single FMA per element (f32)
    o_ref[...] = jnp.where(z >= 0, z, 0.2 * z).astype(o_ref.dtype)


def _bn_lrelu_kernel(y_ref, scale_ref, shift_ref, o_ref):
    """Pass 2 (stored variant): pure epilogue on the bf16 conv intermediate."""
    z = y_ref[...].astype(jnp.float32) * scale_ref[...] + shift_ref[...]
    o_ref[...] = jnp.where(z >= 0, z, 0.2 * z).astype(o_ref.dtype)


# ----------------------------- wrapper ---------------------------------------


def _round_up(x, m):
    return (x + m - 1) // m * m


def _vmem_capacity_bytes():
    try:
        return int(pltpu.get_tpu_info().vmem_capacity_bytes)
    except Exception:
        # Conservative (v7x-sized) fallback.
        return 64 * 1024 * 1024


def _pick_tile_m(m, k_pad, c_pad, tile_m):
    """Generation-aware M-tile: big on v5e/v6e (128 MiB VMEM), smaller on v7x (64 MiB)."""
    if tile_m is None:
        vmem = _vmem_capacity_bytes()
        budget = vmem // 4                           # headroom: pipeline, stats, slack
        budget -= 2 * (2 * k_pad * c_pad)            # resident bf16 weights (worst case 2x)
        # per-row worst case over both passes: bf16 patches (db) + bf16 intermediate (db)
        # + f32 output (db)
        per_row = 2 * (2 * k_pad) + 2 * (2 * c_pad) + 2 * (4 * c_pad)
        tile_m = budget // max(per_row, 1)
        tile_m = max(256, min(tile_m, 4096))
    tile_m = max(8, (int(tile_m) // 8) * 8)          # sublane multiple
    tile_m = min(tile_m, _round_up(m, 8))
    m_pad = _round_up(m, tile_m)
    return tile_m, m_pad


def conv_block_forward(x, weight, gamma, beta, *, stride, padding,
                       tile_m=None, store_conv=None):
    """x: [N, Cin, H, W] (NCHW), weight: [Cout, Cin, kh, kw] (PyTorch layout)."""
    N, Cin, H, W = x.shape
    Cout, _, kh, kw = weight.shape
    Ho = (H + 2 * padding - kh) // stride + 1
    Wo = (W + 2 * padding - kw) // stride + 1
    M = N * Ho * Wo
    K = Cin * kh * kw

    Kp = _round_up(K, 16)      # bf16 sublane packing for the contraction dim
    Cp = _round_up(Cout, 128)  # lane-dense output channels
    TM, Mp = _pick_tile_m(M, Kp, Cp, tile_m)
    grid_m = Mp // TM

    if store_conv is None:
        # Store the bf16 conv intermediate (vs. re-reading patches + re-running the
        # matmul in pass 2) when it saves HBM traffic:  saves ~2*Kp B/row of patch
        # re-reads (and halves MXU work) at a cost of ~4*Cp B/row of intermediate.
        store_conv = 2 * Kp >= 3 * Cp

    vmem_limit = min(_vmem_capacity_bytes() // 2, 64 * 1024 * 1024)

    # --- glue: im2col built in NHWC order (no transpose of the blown-up tensor),
    #           bf16 to halve its HBM footprint. K-order = (kh, kw, Cin). ---
    # TODO(synk): general-stride in-kernel tap accumulation (halo'd NHWC tiles) would
    # avoid materializing the im2col matrix entirely; kept in JAX glue here.
    x_nhwc = jnp.transpose(x, (0, 2, 3, 1)).astype(jnp.bfloat16)
    xp = jnp.pad(x_nhwc, ((0, 0), (padding, padding), (padding, padding), (0, 0)))
    taps = [xp[:, dh:dh + stride * Ho:stride, dw:dw + stride * Wo:stride, :]
            for dh in range(kh) for dw in range(kw)]
    patches = jnp.concatenate(taps, axis=-1).reshape(M, K)
    patches = jnp.pad(patches, ((0, Mp - M), (0, Kp - K)))          # [Mp, Kp] bf16

    # Weight -> [kh, kw, Cin, Cout] -> [K, Cout], zero-padded to [Kp, Cp], bf16.
    w_km = jnp.transpose(weight, (2, 3, 1, 0)).reshape(K, Cout)
    w_p = jnp.pad(w_km, ((0, Kp - K), (0, Cp - Cout))).astype(jnp.bfloat16)

    gamma_p = jnp.pad(gamma.astype(jnp.float32), (0, Cp - Cout))    # padded chans -> 0
    beta_p = jnp.pad(beta.astype(jnp.float32), (0, Cp - Cout))

    cparams = pltpu.CompilerParams(dimension_semantics=("parallel",),
                                   vmem_limit_bytes=vmem_limit)

    in_specs_1 = [pl.BlockSpec((TM, Kp), lambda i: (i, 0)),
                  pl.BlockSpec((Kp, Cp), lambda i: (0, 0))]          # weight resident
    part_spec = pl.BlockSpec((1, 2, Cp), lambda i: (i, 0, 0))
    part_shape = jax.ShapeDtypeStruct((grid_m, 2, Cp), jnp.float32)

    # --- pass 1: conv matmul + per-tile partial BN statistics ---
    if store_conv:
        partials, y_bf16 = pl.pallas_call(
            _conv_stats_store_kernel,
            out_shape=(part_shape, jax.ShapeDtypeStruct((Mp, Cp), jnp.bfloat16)),
            grid_spec=pltpu.PrefetchScalarGridSpec(
                num_scalar_prefetch=0, grid=(grid_m,),
                in_specs=in_specs_1,
                out_specs=(part_spec,
                           pl.BlockSpec((TM, Cp), lambda i: (i, 0)))),
            compiler_params=cparams,
        )(patches, w_p)
    else:
        partials = pl.pallas_call(
            _conv_stats_kernel,
            out_shape=part_shape,
            grid_spec=pltpu.PrefetchScalarGridSpec(
                num_scalar_prefetch=0, grid=(grid_m,),
                in_specs=in_specs_1,
                out_specs=part_spec),
            compiler_params=cparams,
        )(patches, w_p)
        y_bf16 = None

    # --- host glue: fold BN(train-mode, biased var, eps=1e-5) into scale/shift ---
    mean = jnp.sum(partials[:, 0, :], axis=0) / M
    ex2 = jnp.sum(partials[:, 1, :], axis=0) / M
    var = jnp.maximum(ex2 - mean * mean, 0.0)
    scale = gamma_p * jax.lax.rsqrt(var + 1e-5)        # 0 on padded channels
    shift = beta_p - mean * scale                      # 0 on padded channels

    out_spec = pl.BlockSpec((TM, Cp), lambda i: (i, 0))
    affine_spec = pl.BlockSpec((1, Cp), lambda i: (0, 0))

    # --- pass 2: fused BN affine + LeakyReLU (epilogue or recompute variant) ---
    if store_conv:
        out_p = pl.pallas_call(
            _bn_lrelu_kernel,
            out_shape=jax.ShapeDtypeStruct((Mp, Cp), x.dtype),
            grid_spec=pltpu.PrefetchScalarGridSpec(
                num_scalar_prefetch=0, grid=(grid_m,),
                in_specs=[pl.BlockSpec((TM, Cp), lambda i: (i, 0)),
                          affine_spec, affine_spec],
                out_specs=out_spec),
            compiler_params=cparams,
        )(y_bf16, scale.reshape(1, Cp), shift.reshape(1, Cp))
    else:
        out_p = pl.pallas_call(
            _bn_lrelu_matmul_kernel,
            out_shape=jax.ShapeDtypeStruct((Mp, Cp), x.dtype),
            grid_spec=pltpu.PrefetchScalarGridSpec(
                num_scalar_prefetch=0, grid=(grid_m,),
                in_specs=[pl.BlockSpec((TM, Kp), lambda i: (i, 0)),
                          pl.BlockSpec((Kp, Cp), lambda i: (0, 0)),
                          affine_spec, affine_spec],
                out_specs=out_spec),
            compiler_params=cparams,
        )(patches, w_p, scale.reshape(1, Cp), shift.reshape(1, Cp))

    # Drop M/Cout padding, [M, Cout] -> NHWC -> NCHW.
    out = out_p[:M, :Cout].reshape(N, Ho, Wo, Cout).transpose(0, 3, 1, 2)
    return out


# ----------------------------- reference & test ------------------------------


def _reference(x, weight, gamma, beta, *, stride, padding):
    y = jax.lax.conv_general_dilated(
        x, weight, window_strides=(stride, stride),
        padding=[(padding, padding), (padding, padding)],
        dimension_numbers=("NCHW", "OIHW", "NCHW"))
    mean = jnp.mean(y, axis=(0, 2, 3), keepdims=True)
    var = jnp.mean((y - mean) ** 2, axis=(0, 2, 3), keepdims=True)
    yn = (y - mean) * jax.lax.rsqrt(var + 1e-5)
    yn = yn * gamma.reshape(1, -1, 1, 1) + beta.reshape(1, -1, 1, 1)
    return jnp.where(yn >= 0, yn, 0.2 * yn)


if __name__ == "__main__":
    key = jax.random.PRNGKey(0)
    k1, k2, k3, k4 = jax.random.split(key, 4)

    N, Cin, H, W = 2, 4, 16, 16
    Cout, ksize, stride, padding = 8, 3, 1, 1

    x = jax.random.normal(k1, (N, Cin, H, W), dtype=jnp.float32)
    weight = jax.random.normal(k2, (Cout, Cin, ksize, ksize), dtype=jnp.float32) * 0.1
    gamma = jax.random.normal(k3, (Cout,), dtype=jnp.float32) * 0.1 + 1.0
    beta = jax.random.normal(k4, (Cout,), dtype=jnp.float32) * 0.1

    fwd = jax.jit(conv_block_forward,
                  static_argnames=("stride", "padding", "tile_m", "store_conv"))

    # bf16 MXU inputs -> compare against the f32 reference with a bf16-level tolerance.
    TOL = dict(atol=3e-2, rtol=3e-2)

    # 1) auto tile size + auto path (recompute for this tiny Cin); single tile (M=512).
    ref = _reference(x, weight, gamma, beta, stride=stride, padding=padding)
    out = jax.block_until_ready(fwd(x, weight, gamma, beta, stride=stride, padding=padding))
    assert out.shape == (N, Cout, H, W)
    assert jnp.allclose(out, ref, **TOL), float(jnp.max(jnp.abs(out - ref)))

    # 2) forced small tile: multi-tile grid + zero-padded rows in the BN reduction.
    out2 = jax.block_until_ready(
        fwd(x, weight, gamma, beta, stride=stride, padding=padding, tile_m=192))
    assert jnp.allclose(out2, ref, **TOL), float(jnp.max(jnp.abs(out2 - ref)))

    # 3) stride-2 config.
    ref3 = _reference(x, weight, gamma, beta, stride=2, padding=1)
    out3 = jax.block_until_ready(
        fwd(x, weight, gamma, beta, stride=2, padding=1, tile_m=128))
    assert out3.shape == ref3.shape
    assert jnp.allclose(out3, ref3, **TOL), float(jnp.max(jnp.abs(out3 - ref3)))

    # 4) forced stored-intermediate path (the large-Cin fast path), multi-tile + M padding.
    out4 = jax.block_until_ready(
        fwd(x, weight, gamma, beta, stride=stride, padding=padding,
            tile_m=160, store_conv=True))
    assert jnp.allclose(out4, ref, **TOL), float(jnp.max(jnp.abs(out4 - ref)))

    print("KERNEL_OK")
</pallas_src>

<mosaic_0001>
module attributes {stable_mosaic.version = 11 : i64} {
  func.func @_conv_stats_kernel(%arg0: i32, %arg1: memref<512x48xbf16, #tpu.memory_space<vmem>>, %arg2: memref<48x128xbf16, #tpu.memory_space<vmem>>, %arg3: memref<1x2x128xf32, #tpu.memory_space<vmem>>) attributes {dimension_semantics = [#tpu.dimension_semantics<parallel>], iteration_bounds = array<i64: 1>, scalar_prefetch = 0 : i64, scratch_operands = 0 : i64, tpu.core_type = #tpu.core_type<tc>, window_params = [{transform_indices = @transform_0, window_bounds = array<i64: 512, 48>}, {pipeline_mode = #tpu.pipeline_mode<synchronous>, transform_indices = @transform_1, window_bounds = array<i64: 48, 128>}, {transform_indices = @transform_2, window_bounds = array<i64: 1, 2, 128>}]} {
    %c0 = arith.constant 0 : index
    %c0_0 = arith.constant 0 : index
    %0 = vector.load %arg1[%c0, %c0_0] : memref<512x48xbf16, #tpu.memory_space<vmem>>, vector<512x48xbf16>
    %c0_1 = arith.constant 0 : index
    %c0_2 = arith.constant 0 : index
    %1 = vector.load %arg2[%c0_1, %c0_2] : memref<48x128xbf16, #tpu.memory_space<vmem>>, vector<48x128xbf16>
    %cst = arith.constant dense<0.000000e+00> : vector<512x128xf32>
    %2 = tpu.matmul %0, %1, %cst {dimension_numbers = #tpu.dot_dimension_numbers<[1], [0], [0], [1], [0, 0, 1, 1], [], []>} : vector<512x48xbf16>, vector<48x128xbf16>, vector<512x128xf32> -> vector<512x128xf32>
    %cst_3 = arith.constant dense<0.000000e+00> : vector<128xf32>
    %3 = vector.multi_reduction <add>, %2, %cst_3 [0] : vector<512x128xf32> to vector<128xf32>
    %4 = vector.shape_cast %3 : vector<128xf32> to vector<1x128xf32>
    %5 = arith.mulf %2, %2 : vector<512x128xf32>
    %cst_4 = arith.constant dense<0.000000e+00> : vector<128xf32>
    %6 = vector.multi_reduction <add>, %5, %cst_4 [0] : vector<512x128xf32> to vector<128xf32>
    %7 = vector.shape_cast %6 : vector<128xf32> to vector<1x128xf32>
    %8 = tpu.concatenate %4, %7 in 0 : vector<1x128xf32>, vector<1x128xf32> -> vector<2x128xf32>
    %9 = vector.shape_cast %8 : vector<2x128xf32> to vector<1x2x128xf32>
    %c0_5 = arith.constant 0 : index
    %c0_6 = arith.constant 0 : index
    %c0_7 = arith.constant 0 : index
    %10 = vector.load %arg3[%c0_5, %c0_6, %c0_7] : memref<1x2x128xf32, #tpu.memory_space<vmem>>, vector<1x2x128xf32>
    tpu.vector_store %arg3[%c0_5, %c0_6, %c0_7], %9 {strides = array<i32>} : memref<1x2x128xf32, #tpu.memory_space<vmem>>, vector<1x2x128xf32>,
    return
  }
  func.func @transform_0(%arg0: i32) -> (i32, i32) {
    %c0_i32 = arith.constant 0 : i32
    %c0_i32_0 = arith.constant 0 : i32
    return %arg0, %c0_i32 : i32, i32
  }
  func.func @transform_1(%arg0: i32) -> (i32, i32) {
    %c0_i32 = arith.constant 0 : i32
    %c0_i32_0 = arith.constant 0 : i32
    %c0_i32_1 = arith.constant 0 : i32
    return %c0_i32, %c0_i32_0 : i32, i32
  }
  func.func @transform_2(%arg0: i32) -> (i32, i32, i32) {
    %c0_i32 = arith.constant 0 : i32
    %c0_i32_0 = arith.constant 0 : i32
    %c0_i32_1 = arith.constant 0 : i32
    return %arg0, %c0_i32, %c0_i32_0 : i32, i32, i32
  }
}

module attributes {stable_mosaic.version = 11 : i64} {
  func.func @_bn_lrelu_matmul_kernel(%arg0: i32, %arg1: memref<512x48xbf16, #tpu.memory_space<vmem>>, %arg2: memref<48x128xbf16, #tpu.memory_space<vmem>>, %arg3: memref<1x128xf32, #tpu.memory_space<vmem>>, %arg4: memref<1x128xf32, #tpu.memory_space<vmem>>, %arg5: memref<512x128xf32, #tpu.memory_space<vmem>>) attributes {dimension_semantics = [#tpu.dimension_semantics<parallel>], iteration_bounds = array<i64: 1>, scalar_prefetch = 0 : i64, scratch_operands = 0 : i64, tpu.core_type = #tpu.core_type<tc>, window_params = [{transform_indices = @transform_0, window_bounds = array<i64: 512, 48>}, {pipeline_mode = #tpu.pipeline_mode<synchronous>, transform_indices = @transform_1, window_bounds = array<i64: 48, 128>}, {pipeline_mode = #tpu.pipeline_mode<synchronous>, transform_indices = @transform_2, window_bounds = array<i64: 1, 128>}, {pipeline_mode = #tpu.pipeline_mode<synchronous>, transform_indices = @transform_3, window_bounds = array<i64: 1, 128>}, {transform_indices = @transform_4, window_bounds = array<i64: 512, 128>}]} {
    %c0 = arith.constant 0 : index
    %c0_0 = arith.constant 0 : index
    %0 = vector.load %arg1[%c0, %c0_0] : memref<512x48xbf16, #tpu.memory_space<vmem>>, vector<512x48xbf16>
    %c0_1 = arith.constant 0 : index
    %c0_2 = arith.constant 0 : index
    %1 = vector.load %arg2[%c0_1, %c0_2] : memref<48x128xbf16, #tpu.memory_space<vmem>>, vector<48x128xbf16>
    %cst = arith.constant dense<0.000000e+00> : vector<512x128xf32>
    %2 = tpu.matmul %0, %1, %cst {dimension_numbers = #tpu.dot_dimension_numbers<[1], [0], [0], [1], [0, 0, 1, 1], [], []>} : vector<512x48xbf16>, vector<48x128xbf16>, vector<512x128xf32> -> vector<512x128xf32>
    %c0_3 = arith.constant 0 : index
    %c0_4 = arith.constant 0 : index
    %3 = vector.load %arg3[%c0_3, %c0_4] : memref<1x128xf32, #tpu.memory_space<vmem>>, vector<1x128xf32>
    %4 = vector.broadcast %3 : vector<1x128xf32> to vector<512x128xf32>
    %5 = arith.mulf %2, %4 : vector<512x128xf32>
    %c0_5 = arith.constant 0 : index
    %c0_6 = arith.constant 0 : index
    %6 = vector.load %arg4[%c0_5, %c0_6] : memref<1x128xf32, #tpu.memory_space<vmem>>, vector<1x128xf32>
    %7 = vector.broadcast %6 : vector<1x128xf32> to vector<512x128xf32>
    %8 = arith.addf %5, %7 : vector<512x128xf32>
    %cst_7 = arith.constant 0.000000e+00 : f32
    %9 = vector.broadcast %cst_7 : f32 to vector<512x128xf32>
    %10 = arith.cmpf oge, %8, %9 : vector<512x128xf32>
    %cst_8 = arith.constant 2.000000e-01 : f32
    %11 = vector.broadcast %cst_8 : f32 to vector<512x128xf32>
    %12 = arith.mulf %11, %8 : vector<512x128xf32>
    %13 = arith.select %10, %8, %12 : vector<512x128xi1>, vector<512x128xf32>
    %c0_9 = arith.constant 0 : index
    %c0_10 = arith.constant 0 : index
    %14 = vector.load %arg5[%c0_9, %c0_10] : memref<512x128xf32, #tpu.memory_space<vmem>>, vector<512x128xf32>
    tpu.vector_store %arg5[%c0_9, %c0_10], %13 {strides = array<i32>} : memref<512x128xf32, #tpu.memory_space<vmem>>, vector<512x128xf32>,
    return
  }
  func.func @transform_0(%arg0: i32) -> (i32, i32) {
    %c0_i32 = arith.constant 0 : i32
    %c0_i32_0 = arith.constant 0 : i32
    return %arg0, %c0_i32 : i32, i32
  }
  func.func @transform_1(%arg0: i32) -> (i32, i32) {
    %c0_i32 = arith.constant 0 : i32
    %c0_i32_0 = arith.constant 0 : i32
    %c0_i32_1 = arith.constant 0 : i32
    return %c0_i32, %c0_i32_0 : i32, i32
  }
  func.func @transform_2(%arg0: i32) -> (i32, i32) {
    %c0_i32 = arith.constant 0 : i32
    %c0_i32_0 = arith.constant 0 : i32
    %c0_i32_1 = arith.constant 0 : i32
    return %c0_i32, %c0_i32_0 : i32, i32
  }
  func.func @transform_3(%arg0: i32) -> (i32, i32) {
    %c0_i32 = arith.constant 0 : i32
    %c0_i32_0 = arith.constant 0 : i32
    %c0_i32_1 = arith.constant 0 : i32
    return %c0_i32, %c0_i32_0 : i32, i32
  }
  func.func @transform_4(%arg0: i32) -> (i32, i32) {
    %c0_i32 = arith.constant 0 : i32
    %c0_i32_0 = arith.constant 0 : i32
    return %arg0, %c0_i32 : i32, i32
  }
}

</mosaic_0001>

<bundles_post_ra>
// kernel: conv_block_forward.2
= control target key start
LH: loop header
LB: loop body
LE: loop exit
PB: predicated region body
PF: predicated region fallthrough
CT: control target
= control target key end

     0   :  { %vm260_vm0 = vcmask 392192   ;;  %vm728_vm1 = vcmask 1040384   ;;  %s1276_s1 = inlined_call_operand.vmem [shape: bf16[48,128], index: 1, kind: input, shape index: {}]   ;;  %s1277_s0 = inlined_call_operand.vmem [shape: bf16[512,48], index: 0, kind: input, shape index: {}]   ;;  %s1278_s2 = inlined_call_operand.vmem [shape: f32[1,2,128], index: 2, kind: output, shape index: {}]  }
   0x1   :  { %v941_v0 = vld [vmem:[%s1276_s1 + $0x10] sm:$0xff]  ;;  %v940_v1 = vld [vmem:[%s1276_s1 + $0x8] sm:$0xff]  ;;  %v939_v2 = vld [vmem:[%s1276_s1] sm:$0xff] }
   0x2   :  { %362 = vmatpush.bf16.msra.mxu0 %v941_v0  ;;  %942 = vmatpush.bf16.msra.mxu1 %v941_v0  ;;  %v907_v3 = vld [vmem:[%s1277_s0] sm:$0xff]  ;;  %v908_v5 = vld [vmem:[%s1277_s0 + $0x8] sm:$0xff]  ;;  %v909_v8 = vld [vmem:[%s1277_s0 + $0x10] sm:$0xff] }
   0x3   :  { %943 = vmatpush.bf16.msra.mxu2 %v941_v0  ;;  %944 = vmatpush.bf16.msra.mxu3 %v941_v0  ;;  %v915_v4 = vld [vmem:[%s1277_s0 + $0x40] sm:$0xff]  ;;  %v916_v6 = vld [vmem:[%s1277_s0 + $0x48] sm:$0xff]  ;;  %v917_v9 = vld [vmem:[%s1277_s0 + $0x50] sm:$0xff] }
   0x4   :  { %v923_v7 = vld [vmem:[%s1277_s0 + $0x80] sm:$0xff]  ;;  %v924_v10 = vld [vmem:[%s1277_s0 + $0x88] sm:$0xff]  ;;  %v910_v11 = vld [vmem:[%s1277_s0 + $0x18] sm:$0xff] }
   0x5   :  { %v918_v12 = vld [vmem:[%s1277_s0 + $0x58] sm:$0xff]  ;;  %v925_v13 = vld [vmem:[%s1277_s0 + $0x90] sm:$0xff]  ;;  %v931_v14 = vld [vmem:[%s1277_s0 + $0xc0] sm:$0xff] }
   0x6   :  { %363 = vmatpush.bf16.msra.mxu0 %v940_v1  ;;  %945 = vmatpush.bf16.msra.mxu1 %v940_v1  ;;  %v911_v15 = vld [vmem:[%s1277_s0 + $0x20] sm:$0xff]  ;;  %v926_v17 = vld [vmem:[%s1277_s0 + $0x98] sm:$0xff]  ;;  %v932_v18 = vld [vmem:[%s1277_s0 + $0xc8] sm:$0xff] }
   0x7   :  { %946 = vmatpush.bf16.msra.mxu2 %v940_v1  ;;  %947 = vmatpush.bf16.msra.mxu3 %v940_v1  ;;  %v919_v16 = vld [vmem:[%s1277_s0 + $0x60] sm:$0xff]  ;;  %v912_v19 = vld [vmem:[%s1277_s0 + $0x28] sm:$0xff]  ;;  %v933_v22 = vld [vmem:[%s1277_s0 + $0xd0] sm:$0xff] }
   0x8   :  { %v920_v20 = vld [vmem:[%s1277_s0 + $0x68] sm:$0xff]  ;;  %v927_v21 = vld [vmem:[%s1277_s0 + $0xa0] sm:$0xff]  ;;  %v913_v23 = vld [vmem:[%s1277_s0 + $0x30] sm:$0xff] }
   0x9   :  { %v921_v24 = vld [vmem:[%s1277_s0 + $0x70] sm:$0xff]  ;;  %v928_v25 = vld [vmem:[%s1277_s0 + $0xa8] sm:$0xff]  ;;  %v934_v26 = vld [vmem:[%s1277_s0 + $0xd8] sm:$0xff] }
   0xa   :  { %364 = vmatpush.bf16.msra.mxu0 %v939_v2  ;;  %948 = vmatpush.bf16.msra.mxu1 %v939_v2  ;;  %v914_v27 = vld [vmem:[%s1277_s0 + $0x38] sm:$0xff]  ;;  %v929_v29 = vld [vmem:[%s1277_s0 + $0xb0] sm:$0xff]  ;;  %v935_v30 = vld [vmem:[%s1277_s0 + $0xe0] sm:$0xff] }
   0xb   :  { %949 = vmatpush.bf16.msra.mxu2 %v939_v2  ;;  %950 = vmatpush.bf16.msra.mxu3 %v939_v2  ;;  %v922_v28 = vld [vmem:[%s1277_s0 + $0x78] sm:$0xff]  ;;  %v936_v34 = vld [vmem:[%s1277_s0 + $0xe8] sm:$0xff]  ;;  %v937_v45 = vld [vmem:[%s1277_s0 + $0xf0] sm:$0xff] }
   0xc   :  { %v930_v33 = vld [vmem:[%s1277_s0 + $0xb8] sm:$0xff] }
   0xd   :  { %875 = vmatmul.msk.bf16.vlgmr.msra.gmra.mxu0 %vm260_vm0, %v907_v3  ;;  %883 = vmatmul.msk.bf16.vlgmr.msra.gmra.mxu1 %vm260_vm0, %v915_v4  ;;  %v938_v57 = vld [vmem:[%s1277_s0 + $0xf8] sm:$0xff] }
   0xe   :  { %891 = vmatmul.msk.bf16.vlgmr.msra.gmra.mxu2 %vm260_vm0, %v923_v7  ;;  %899 = vmatmul.msk.bf16.vlgmr.msra.gmra.mxu3 %vm260_vm0, %v931_v14 }
  0x1d   :  { %876 = vmatmul.msk.bf16.gmra.mxu0 %vm260_vm0, %v908_v5  ;;  %884 = vmatmul.msk.bf16.gmra.mxu1 %vm260_vm0, %v916_v6 }
  0x1e   :  { %892 = vmatmul.msk.bf16.gmra.mxu2 %vm260_vm0, %v924_v10  ;;  %900 = vmatmul.msk.bf16.gmra.mxu3 %vm260_vm0, %v932_v18 }
  0x2d   :  { %877 = vmatmul.msk.bf16.gmra.mxu0 %vm260_vm0, %v909_v8  ;;  %885 = vmatmul.msk.bf16.gmra.mxu1 %vm260_vm0, %v917_v9 }
  0x2e   :  { %893 = vmatmul.msk.bf16.gmra.mxu2 %vm260_vm0, %v925_v13  ;;  %901 = vmatmul.msk.bf16.gmra.mxu3 %vm260_vm0, %v933_v22 }
  0x3d   :  { %878 = vmatmul.msk.bf16.gmra.mxu0 %vm260_vm0, %v910_v11  ;;  %886 = vmatmul.msk.bf16.gmra.mxu1 %vm260_vm0, %v918_v12 }
  0x3e   :  { %894 = vmatmul.msk.bf16.gmra.mxu2 %vm260_vm0, %v926_v17  ;;  %902 = vmatmul.msk.bf16.gmra.mxu3 %vm260_vm0, %v934_v26 }
  0x4d   :  { %879 = vmatmul.msk.bf16.gmra.mxu0 %vm260_vm0, %v911_v15  ;;  %887 = vmatmul.msk.bf16.gmra.mxu1 %vm260_vm0, %v919_v16 }
  0x4e   :  { %895 = vmatmul.msk.bf16.gmra.mxu2 %vm260_vm0, %v927_v21  ;;  %903 = vmatmul.msk.bf16.gmra.mxu3 %vm260_vm0, %v935_v30 }
  0x5d   :  { %880 = vmatmul.msk.bf16.gmra.mxu0 %vm260_vm0, %v912_v19  ;;  %888 = vmatmul.msk.bf16.gmra.mxu1 %vm260_vm0, %v920_v20 }
  0x5e   :  { %896 = vmatmul.msk.bf16.gmra.mxu2 %vm260_vm0, %v928_v25  ;;  %904 = vmatmul.msk.bf16.gmra.mxu3 %vm260_vm0, %v936_v34 }
  0x6d   :  { %881 = vmatmul.msk.bf16.gmra.mxu0 %vm260_vm0, %v913_v23  ;;  %889 = vmatmul.msk.bf16.gmra.mxu1 %vm260_vm0, %v921_v24 }
  0x6e   :  { %897 = vmatmul.msk.bf16.gmra.mxu2 %vm260_vm0, %v929_v29  ;;  %905 = vmatmul.msk.bf16.gmra.mxu3 %vm260_vm0, %v937_v45 }
  0x7d   :  { %882 = vmatmul.msk.bf16.gmra.mxu0 %vm260_vm0, %v914_v27  ;;  %890 = vmatmul.msk.bf16.gmra.mxu1 %vm260_vm0, %v922_v28 }
  0x7e   :  { %898 = vmatmul.msk.bf16.gmra.mxu2 %vm260_vm0, %v930_v33  ;;  %906 = vmatmul.msk.bf16.gmra.mxu3 %vm260_vm0, %v938_v57 }
  0x8a   :  { %v366_v31 = vpop.f32.mrf.mxu0  ;;  %v1087_v32 = vpop.f32.mrf.mxu1 }
  0x8b   :  { %v595_v36 = vmul.f32 %v366_v31, %v366_v31 }
  0x91   :  { %v1107_v53 = vpop.f32.mrf.mxu2  ;;  %v1125_v4 = vpop.f32.mrf.mxu3 }
  0x92   :  { %v368_v35 = vpop.f32.mrf.mxu0  ;;  %v1097_v39 = vpop.f32.mrf.mxu1 }
  0x93   :  { %v526_v37 = vadd.f32 %v368_v35, %v366_v31  ;;  %v596_v38 = vmul.f32 %v368_v35, %v368_v35 }
  0x95   :  { %v659_v40 = vadd.f32 %v596_v38, %v595_v36 }
  0x99   :  { %v1115_v60 = vpop.f32.mrf.mxu2  ;;  %v1131_v8 = vpop.f32.mrf.mxu3 }
  0x9a   :  { %v371_v41 = vpop.f32.mrf.mxu0  ;;  %v1102_v46 = vpop.f32.mrf.mxu1 }
  0x9b   :  { %v527_v42 = vadd.f32 %v526_v37, %v371_v41  ;;  %v597_v43 = vmul.f32 %v371_v41, %v371_v41 }
  0x9d   :  { %v660_v44 = vadd.f32 %v659_v40, %v597_v43 }
  0xa1   :  { %v1119_v63 = vpop.f32.mrf.mxu2  ;;  %v1137_v12 = vpop.f32.mrf.mxu3 }
  0xa2   :  { %v373_v47 = vpop.f32.mrf.mxu0  ;;  %v1105_v51 = vpop.f32.mrf.mxu1 }
  0xa3   :  { %v528_v48 = vadd.f32 %v527_v42, %v373_v47  ;;  %v598_v49 = vmul.f32 %v373_v47, %v373_v47 }
  0xa5   :  { %v661_v50 = vadd.f32 %v660_v44, %v598_v49 }
  0xa9   :  { %v1123_v2 = vpop.f32.mrf.mxu2  ;;  %v1143_v16 = vpop.f32.mrf.mxu3 }
  0xaa   :  { %v376_v52 = vpop.f32.mrf.mxu0  ;;  %v1113_v59 = vpop.f32.mrf.mxu1 }
  0xab   :  { %v529_v54 = vadd.f32 %v528_v48, %v376_v52  ;;  %v599_v55 = vmul.f32 %v376_v52, %v376_v52 }
  0xad   :  { %v662_v56 = vadd.f32 %v661_v50, %v599_v55 }
  0xb1   :  { %v1129_v7 = vpop.f32.mrf.mxu2  ;;  %v1149_v27 = vpop.f32.mrf.mxu3 }
  0xb2   :  { %v378_v58 = vpop.f32.mrf.mxu0  ;;  %v1117_v62 = vpop.f32.mrf.mxu1 }
  0xb3   :  { %v600_v18 = vmul.f32 %v378_v58, %v378_v58  ;;  %v530_v20 = vadd.f32 %v529_v54, %v378_v58 }
  0xb5   :  { %v663_v23 = vadd.f32 %v662_v56, %v600_v18 }
  0xb9   :  { %v1135_v11 = vpop.f32.mrf.mxu2  ;;  %v1155_v49 = vpop.f32.mrf.mxu3 }
  0xba   :  { %v381_v61 = vpop.f32.mrf.mxu0  ;;  %v1121_v1 = vpop.f32.mrf.mxu1 }
  0xbb   :  { %v601_v21 = vmul.f32 %v381_v61, %v381_v61  ;;  %v531_v24 = vadd.f32 %v530_v20, %v381_v61 }
  0xbd   :  { %v664_v28 = vadd.f32 %v663_v23, %v601_v21 }
  0xc1   :  { %v1141_v15 = vpop.f32.mrf.mxu2 }
  0xc2   :  { %v383_v0 = vpop.f32.mrf.mxu0  ;;  %v1127_v5 = vpop.f32.mrf.mxu1 }
  0xc3   :  { %v602_v25 = vmul.f32 %v383_v0, %v383_v0  ;;  %v532_v29 = vadd.f32 %v531_v24, %v383_v0  ;;  %v612_v24 = vmul.f32 %v1097_v39, %v1097_v39 }
  0xc5   :  { %v665_v31 = vadd.f32 %v664_v28, %v602_v25  ;;  %v613_v28 = vmul.f32 %v1102_v46, %v1102_v46 }
  0xc9   :  { %v1147_v22 = vpop.f32.mrf.mxu2 }
  0xca   :  { %v386_v3 = vpop.f32.mrf.mxu0  ;;  %v1133_v10 = vpop.f32.mrf.mxu1 }
  0xcb   :  { %v603_v30 = vmul.f32 %v386_v3, %v386_v3  ;;  %v533_v33 = vadd.f32 %v532_v29, %v386_v3 }
  0xcd   :  { %v666_v35 = vadd.f32 %v665_v31, %v603_v30  ;;  %v614_v31 = vmul.f32 %v1105_v51, %v1105_v51 }
  0xd1   :  { %v1153_v44 = vpop.f32.mrf.mxu2 }
  0xd2   :  { %v388_v6 = vpop.f32.mrf.mxu0  ;;  %v1139_v14 = vpop.f32.mrf.mxu1 }
  0xd3   :  { %v604_v34 = vmul.f32 %v388_v6, %v388_v6  ;;  %v534_v36 = vadd.f32 %v533_v33, %v388_v6 }
  0xd5   :  { %v667_v40 = vadd.f32 %v666_v35, %v604_v34  ;;  %v615_v35 = vmul.f32 %v1113_v59, %v1113_v59 }
  0xd9   :  { %v1157_v20 = vpop.f32.mrf.mxu2 }
  0xda   :  { %v391_v9 = vpop.f32.mrf.mxu0  ;;  %v1145_v19 = vpop.f32.mrf.mxu1 }
  0xdb   :  { %v605_v37 = vmul.f32 %v391_v9, %v391_v9  ;;  %v535_v41 = vadd.f32 %v534_v36, %v391_v9 }
  0xdd   :  { %v668_v45 = vadd.f32 %v667_v40, %v605_v37  ;;  %v616_v40 = vmul.f32 %v1117_v62, %v1117_v62 }
  0xe1   :  { %v1176_v37 = vpop.f32.mrf.mxu2 }
  0xe2   :  { %v393_v13 = vpop.f32.mrf.mxu0  ;;  %v1151_v38 = vpop.f32.mrf.mxu1 }
  0xe3   :  { %v606_v42 = vmul.f32 %v393_v13, %v393_v13  ;;  %v536_v47 = vadd.f32 %v535_v41, %v393_v13  ;;  %v611_v13 = vmul.f32 %v1087_v32, %v1087_v32 }
  0xe5   :  { %v669_v50 = vadd.f32 %v668_v45, %v606_v42 }
  0xea   :  { %v396_v17 = vpop.f32.mrf.mxu0  ;;  %v436_v3 = vpop.f32.mrf.mxu1 }
  0xeb   :  { %v607_v48 = vmul.f32 %v396_v17, %v396_v17  ;;  %v537_v52 = vadd.f32 %v536_v47, %v396_v17  ;;  %v1162_v17 = vpop.f32.mrf.mxu3 }
  0xed   :  { %v670_v55 = vadd.f32 %v669_v50, %v607_v48  ;;  %v619_v50 = vmul.f32 %v1133_v10, %v1133_v10 }
  0xf2   :  { %v398_v26 = vpop.f32.mrf.mxu0  ;;  %v438_v34 = vpop.f32.mrf.mxu1 }
  0xf3   :  { %v608_v54 = vmul.f32 %v398_v26, %v398_v26  ;;  %v538_v56 = vadd.f32 %v537_v52, %v398_v26  ;;  %v1181_v42 = vpop.f32.mrf.mxu3 }
  0xf5   :  { %v671_v58 = vadd.f32 %v670_v55, %v608_v54  ;;  %v620_v55 = vmul.f32 %v1139_v14, %v1139_v14 }
  0xfa   :  { %v401_v43 = vpop.f32.mrf.mxu0  ;;  %v441_v54 = vpop.f32.mrf.mxu1 }
  0xfb   :  { %v609_v57 = vmul.f32 %v401_v43, %v401_v43  ;;  %v539_v61 = vadd.f32 %v538_v56, %v401_v43 }
  0xfd   :  { %v672_v6 = vadd.f32 %v671_v58, %v609_v57  ;;  %v621_v58 = vmul.f32 %v1145_v19, %v1145_v19 }
 0x102   :  { %v403_v0 = vpop.f32.mrf.mxu0 }
 0x103   :  { %v540_v9 = vadd.f32 %v539_v61, %v403_v0  ;;  %v610_v18 = vmul.f32 %v403_v0, %v403_v0  ;;  %v1198_v0 = vpop.f32.mrf.mxu3 }
 0x105   :  { %v541_v21 = vadd.f32 %v540_v9, %v1087_v32  ;;  %v673_v23 = vadd.f32 %v672_v6, %v610_v18 }
 0x107   :  { %v542_v25 = vadd.f32 %v541_v21, %v1097_v39  ;;  %v674_v26 = vadd.f32 %v673_v23, %v611_v13  ;;  %v623_v13 = vmul.f32 %v436_v3, %v436_v3 }
 0x109   :  { %v543_v29 = vadd.f32 %v542_v25, %v1102_v46  ;;  %v675_v30 = vadd.f32 %v674_v26, %v612_v24  ;;  %v624_v24 = vmul.f32 %v438_v34, %v438_v34  ;;  %v443_v25 = vpop.f32.mrf.mxu1 }
 0x10b   :  { %v544_v32 = vadd.f32 %v543_v29, %v1105_v51  ;;  %v676_v33 = vadd.f32 %v675_v30, %v613_v28  ;;  %v617_v51 = vmul.f32 %v1121_v1, %v1121_v1  ;;  %v625_v29 = vmul.f32 %v441_v54, %v441_v54 }
 0x10d   :  { %v545_v36 = vadd.f32 %v544_v32, %v1113_v59  ;;  %v677_v39 = vadd.f32 %v676_v33, %v614_v31  ;;  %v618_v59 = vmul.f32 %v1127_v5, %v1127_v5  ;;  %v626_v32 = vmul.f32 %v443_v25, %v443_v25  ;;  %v1203_v33 = vpop.f32.mrf.mxu3 }
 0x10f   :  { %v546_v46 = vadd.f32 %v545_v36, %v1117_v62  ;;  %v678_v41 = vadd.f32 %v677_v39, %v615_v35  ;;  %v628_v36 = vmul.f32 %v1115_v60, %v1115_v60 }
 0x111   :  { %v679_v43 = vadd.f32 %v678_v41, %v616_v40  ;;  %v547_v45 = vadd.f32 %v546_v46, %v1121_v1  ;;  %v473_v1 = vpop.f32.mrf.mxu2  ;;  %v629_v40 = vmul.f32 %v1119_v63, %v1119_v63 }
 0x113   :  { %v548_v47 = vadd.f32 %v547_v45, %v1127_v5  ;;  %v680_v48 = vadd.f32 %v679_v43, %v617_v51  ;;  %v630_v51 = vmul.f32 %v1123_v2, %v1123_v2 }
 0x115   :  { %v549_v62 = vadd.f32 %v548_v47, %v1133_v10  ;;  %v681_v52 = vadd.f32 %v680_v48, %v618_v59  ;;  %v622_v10 = vmul.f32 %v1151_v38, %v1151_v38  ;;  %v631_v59 = vmul.f32 %v1129_v7, %v1129_v7  ;;  %v1220_v48 = vpop.f32.mrf.mxu3 }
 0x117   :  { %v550_v56 = vadd.f32 %v549_v62, %v1139_v14  ;;  %v682_v57 = vadd.f32 %v681_v52, %v619_v50  ;;  %v632_v50 = vmul.f32 %v1135_v11, %v1135_v11  ;;  %v633_v52 = vmul.f32 %v1141_v15, %v1141_v15 }
 0x119   :  { %v551_v5 = vadd.f32 %v550_v56, %v1145_v19  ;;  %v683_v61 = vadd.f32 %v682_v57, %v620_v55  ;;  %v476_v19 = vpop.f32.mrf.mxu2  ;;  %v634_v55 = vmul.f32 %v1147_v22, %v1147_v22  ;;  %v635_v57 = vmul.f32 %v1153_v44, %v1153_v44 }
 0x11b   :  { %v552_v6 = vadd.f32 %v551_v5, %v1151_v38  ;;  %v684_v9 = vadd.f32 %v683_v61, %v621_v58  ;;  %v627_v38 = vmul.f32 %v1107_v53, %v1107_v53  ;;  %v636_v61 = vmul.f32 %v1157_v20, %v1157_v20 }
 0x11d   :  { %v553_v18 = vadd.f32 %v552_v6, %v436_v3  ;;  %v685_v21 = vadd.f32 %v684_v9, %v622_v10  ;;  %v637_v9 = vmul.f32 %v1176_v37, %v1176_v37 }
 0x11f   :  { %v686_v14 = vadd.f32 %v685_v21, %v623_v13  ;;  %v554_v23 = vadd.f32 %v553_v18, %v438_v34  ;;  %v638_v21 = vmul.f32 %v473_v1, %v473_v1 }
 0x121   :  { %v687_v26 = vadd.f32 %v686_v14, %v624_v24  ;;  %v555_v28 = vadd.f32 %v554_v23, %v441_v54  ;;  %v639_v24 = vmul.f32 %v476_v19, %v476_v19 }
 0x123   :  { %v688_v30 = vadd.f32 %v687_v26, %v625_v29  ;;  %v556_v31 = vadd.f32 %v555_v28, %v443_v25 }
 0x125   :  { %v557_v35 = vadd.f32 %v556_v31, %v1107_v53  ;;  %v689_v3 = vadd.f32 %v688_v30, %v626_v32  ;;  %v478_v53 = vpop.f32.mrf.mxu2 }
 0x126   :  { %v640_v28 = vmul.f32 %v478_v53, %v478_v53 }
 0x127   :  { %v558_v34 = vadd.f32 %v557_v35, %v1115_v60  ;;  %v690_v39 = vadd.f32 %v689_v3, %v627_v38 }
 0x129   :  { %v559_v46 = vadd.f32 %v558_v34, %v1119_v63  ;;  %v691_v41 = vadd.f32 %v690_v39, %v628_v36 }
 0x12b   :  { %v560_v43 = vadd.f32 %v559_v46, %v1123_v2  ;;  %v692_v45 = vadd.f32 %v691_v41, %v629_v40  ;;  %v645_v40 = vmul.f32 %v1137_v12, %v1137_v12 }
 0x12d   :  { %v561_v47 = vadd.f32 %v560_v43, %v1129_v7  ;;  %v693_v60 = vadd.f32 %v692_v45, %v630_v51  ;;  %v646_v51 = vmul.f32 %v1143_v16, %v1143_v16 }
 0x12f   :  { %v562_v63 = vadd.f32 %v561_v47, %v1135_v11  ;;  %v694_v62 = vadd.f32 %v693_v60, %v631_v59  ;;  %v481_v11 = vpop.f32.mrf.mxu2  ;;  %v648_v47 = vmul.f32 %v1155_v49, %v1155_v49 }
 0x130   :  { %v641_v31 = vmul.f32 %v481_v11, %v481_v11 }
 0x131   :  { %v695_v2 = vadd.f32 %v694_v62, %v632_v50  ;;  %v563_v54 = vadd.f32 %v562_v63, %v1141_v15  ;;  %v513_v15 = vpop.f32.mrf.mxu3  ;;  %v649_v50 = vmul.f32 %v1162_v17, %v1162_v17  ;;  %v650_v62 = vmul.f32 %v1181_v42, %v1181_v42 }
 0x133   :  { %v564_v7 = vadd.f32 %v563_v54, %v1147_v22  ;;  %v696_v56 = vadd.f32 %v695_v2, %v633_v52 }
 0x135   :  { %v565_v58 = vadd.f32 %v564_v7, %v1153_v44  ;;  %v697_v5 = vadd.f32 %v696_v56, %v634_v55  ;;  %v652_v7 = vmul.f32 %v1203_v33, %v1203_v33 }
 0x137   :  { %v566_v10 = vadd.f32 %v565_v58, %v1157_v20  ;;  %v698_v6 = vadd.f32 %v697_v5, %v635_v57  ;;  %v483_v29 = vpop.f32.mrf.mxu2 }
 0x138   :  { %v642_v3 = vmul.f32 %v483_v29, %v483_v29 }
 0x139   :  { %v567_v22 = vadd.f32 %v566_v10, %v1176_v37  ;;  %v699_v18 = vadd.f32 %v698_v6, %v636_v61  ;;  %v516_v32 = vpop.f32.mrf.mxu3  ;;  %v643_v37 = vmul.f32 %v1125_v4, %v1125_v4 }
 0x13b   :  { %v568_v13 = vadd.f32 %v567_v22, %v473_v1  ;;  %v700_v14 = vadd.f32 %v699_v18, %v637_v9 }
 0x13d   :  { %v701_v23 = vadd.f32 %v700_v14, %v638_v21  ;;  %v569_v44 = vadd.f32 %v568_v13, %v476_v19  ;;  %v644_v19 = vmul.f32 %v1131_v8, %v1131_v8 }
 0x13f   :  { %v702_v25 = vadd.f32 %v701_v23, %v639_v24  ;;  %v570_v26 = vadd.f32 %v569_v44, %v478_v53  ;;  %v647_v53 = vmul.f32 %v1149_v27, %v1149_v27 }
 0x141   :  { %v703_v30 = vadd.f32 %v702_v25, %v640_v28  ;;  %v571_v20 = vadd.f32 %v570_v26, %v481_v11  ;;  %v654_v11 = vmul.f32 %v513_v15, %v513_v15 }
 0x143   :  { %v704_v38 = vadd.f32 %v703_v30, %v641_v31  ;;  %v572_v35 = vadd.f32 %v571_v20, %v483_v29 }
 0x145   :  { %v573_v1 = vadd.f32 %v572_v35, %v1125_v4  ;;  %v705_v36 = vadd.f32 %v704_v38, %v642_v3  ;;  %v518_v4 = vpop.f32.mrf.mxu3 }
 0x146   :  { %v656_v18 = vmul.f32 %v518_v4, %v518_v4 }
 0x147   :  { %v574_v34 = vadd.f32 %v573_v1, %v1131_v8  ;;  %v706_v39 = vadd.f32 %v705_v36, %v643_v37 }
 0x149   :  { %v575_v46 = vadd.f32 %v574_v34, %v1137_v12  ;;  %v707_v41 = vadd.f32 %v706_v39, %v644_v19 }
 0x14b   :  { %v576_v43 = vadd.f32 %v575_v46, %v1143_v16  ;;  %v708_v45 = vadd.f32 %v707_v41, %v645_v40 }
 0x14d   :  { %v577_v59 = vadd.f32 %v576_v43, %v1149_v27  ;;  %v709_v8 = vadd.f32 %v708_v45, %v646_v51  ;;  %v651_v27 = vmul.f32 %v1198_v0, %v1198_v0 }
 0x14f   :  { %v578_v60 = vadd.f32 %v577_v59, %v1155_v49  ;;  %v710_v12 = vadd.f32 %v709_v8, %v647_v53  ;;  %v521_v49 = vpop.f32.mrf.mxu3 }
 0x151   :  { %v711_v63 = vadd.f32 %v710_v12, %v648_v47  ;;  %v579_v16 = vadd.f32 %v578_v60, %v1162_v17  ;;  %v653_v17 = vmul.f32 %v1220_v48, %v1220_v48 }
 0x153   :  { %v580_v52 = vadd.f32 %v579_v16, %v1181_v42  ;;  %v712_v2 = vadd.f32 %v711_v63, %v649_v50 }
 0x155   :  { %v581_v54 = vadd.f32 %v580_v52, %v1198_v0  ;;  %v713_v55 = vadd.f32 %v712_v2, %v650_v62  ;;  %v655_v0 = vmul.f32 %v516_v32, %v516_v32 }
 0x157   :  { %v582_v56 = vadd.f32 %v581_v54, %v1203_v33  ;;  %v714_v57 = vadd.f32 %v713_v55, %v651_v27  ;;  %v523_v13 = vpop.f32.mrf.mxu3  ;;  %v657_v33 = vmul.f32 %v521_v49, %v521_v49 }
 0x158   :  { %v658_v24 = vmul.f32 %v523_v13, %v523_v13 }
 0x159   :  { %v583_v58 = vadd.f32 %v582_v56, %v1220_v48  ;;  %v715_v42 = vadd.f32 %v714_v57, %v652_v7 }
 0x15b   :  { %v584_v5 = vadd.f32 %v583_v58, %v513_v15  ;;  %v716_v61 = vadd.f32 %v715_v42, %v653_v17 }
 0x15d   :  { %v717_v10 = vadd.f32 %v716_v61, %v654_v11  ;;  %v585_v6 = vadd.f32 %v584_v5, %v516_v32 }
 0x15f   :  { %v718_v9 = vadd.f32 %v717_v10, %v655_v0  ;;  %v586_v22 = vadd.f32 %v585_v6, %v518_v4 }
 0x161   :  { %v719_v21 = vadd.f32 %v718_v9, %v656_v18  ;;  %v587_v14 = vadd.f32 %v586_v22, %v521_v49 }
 0x163   :  { %v720_v23 = vadd.f32 %v719_v21, %v657_v33  ;;  %v588_v44 = vadd.f32 %v587_v14, %v523_v13 }
 0x165   :  { %v589_v25 = vrot.slane %v588_v44, 4  ;;  %v721_v26 = vadd.f32 %v720_v23, %v658_v24 }
 0x167   :  { %v590_v48 = vadd.f32 %v589_v25, %v588_v44  ;;  %v722_v28 = vrot.slane %v721_v26, 4 }
 0x169   :  { %v591_v29 = vrot.slane %v590_v48, 2  ;;  %v723_v15 = vadd.f32 %v722_v28, %v721_v26 }
 0x16b   :  { %v592_v30 = vadd.f32 %v591_v29, %v590_v48  ;;  %v724_v20 = vrot.slane %v723_v15, 2 }
 0x16d   :  { %v593_v31 = vrot.slane %v592_v30, 1  ;;  %v725_v32 = vadd.f32 %v724_v20, %v723_v15 }
 0x16f   :  { %v726_v38 = vrot.slane %v725_v32, 1  ;;  %v594_v35 = vadd.f32 %v593_v31, %v592_v30 }
 0x171   :  { %v727_v3 = vadd.f32 %v726_v38, %v725_v32 }
 0x173   :  { %v729_v37 = vsel %vm728_vm1, %v594_v35, %v727_v3 }
 0x174   :  { %730 = vst [vmem:[%s1278_s2] sm:$0x3] %v729_v37 }

// kernel: conv_block_forward.3
= control target key start
LH: loop header
LB: loop body
LE: loop exit
PB: predicated region body
PF: predicated region fallthrough
CT: control target
= control target key end

     0   :  { %vm266_vm0 = vcmask 392192   ;;  %s1638_s1 = inlined_call_operand.vmem [shape: bf16[48,128], index: 1, kind: input, shape index: {}]   ;;  %s1639_s2 = inlined_call_operand.vmem [shape: f32[1,128], index: 2, kind: input, shape index: {}]   ;;  %s1640_s3 = inlined_call_operand.vmem [shape: f32[1,128], index: 3, kind: input, shape index: {}]   ;;  %s1641_s0 = inlined_call_operand.vmem [shape: bf16[512,48], index: 0, kind: input, shape index: {}]   ;;  %s1642_s4 = inlined_call_operand.vmem [shape: f32[512,128], index: 4, kind: output, shape index: {}]  }
   0x1   :  { %v1134_v0 = vld [vmem:[%s1638_s1 + $0x10] sm:$0xff]  ;;  %v1133_v1 = vld [vmem:[%s1638_s1 + $0x8] sm:$0xff]  ;;  %v1132_v2 = vld [vmem:[%s1638_s1] sm:$0xff] }
   0x2   :  { %368 = vmatpush.bf16.msra.mxu0 %v1134_v0  ;;  %1135 = vmatpush.bf16.msra.mxu1 %v1134_v0  ;;  %v1100_v3 = vld [vmem:[%s1641_s0] sm:$0xff]  ;;  %v1101_v7 = vld [vmem:[%s1641_s0 + $0x8] sm:$0xff]  ;;  %v1102_v11 = vld [vmem:[%s1641_s0 + $0x10] sm:$0xff] }
   0x3   :  { %1136 = vmatpush.bf16.msra.mxu2 %v1134_v0  ;;  %1137 = vmatpush.bf16.msra.mxu3 %v1134_v0  ;;  %v1108_v4 = vld [vmem:[%s1641_s0 + $0x40] sm:$0xff]  ;;  %v1109_v8 = vld [vmem:[%s1641_s0 + $0x48] sm:$0xff]  ;;  %v1110_v12 = vld [vmem:[%s1641_s0 + $0x50] sm:$0xff] }
   0x4   :  { %v1116_v5 = vld [vmem:[%s1641_s0 + $0x80] sm:$0xff]  ;;  %v1117_v9 = vld [vmem:[%s1641_s0 + $0x88] sm:$0xff]  ;;  %v1118_v13 = vld [vmem:[%s1641_s0 + $0x90] sm:$0xff] }
   0x5   :  { %v1124_v6 = vld [vmem:[%s1641_s0 + $0xc0] sm:$0xff]  ;;  %v1125_v10 = vld [vmem:[%s1641_s0 + $0xc8] sm:$0xff]  ;;  %v1126_v14 = vld [vmem:[%s1641_s0 + $0xd0] sm:$0xff] }
   0x6   :  { %369 = vmatpush.bf16.msra.mxu0 %v1133_v1  ;;  %1138 = vmatpush.bf16.msra.mxu1 %v1133_v1  ;;  %v1103_v15 = vld [vmem:[%s1641_s0 + $0x18] sm:$0xff]  ;;  %v1104_v19 = vld [vmem:[%s1641_s0 + $0x20] sm:$0xff]  ;;  %v1105_v23 = vld [vmem:[%s1641_s0 + $0x28] sm:$0xff] }
   0x7   :  { %1139 = vmatpush.bf16.msra.mxu2 %v1133_v1  ;;  %1140 = vmatpush.bf16.msra.mxu3 %v1133_v1  ;;  %v1111_v16 = vld [vmem:[%s1641_s0 + $0x58] sm:$0xff]  ;;  %v1112_v20 = vld [vmem:[%s1641_s0 + $0x60] sm:$0xff]  ;;  %v1113_v24 = vld [vmem:[%s1641_s0 + $0x68] sm:$0xff] }
   0x8   :  { %v1119_v17 = vld [vmem:[%s1641_s0 + $0x98] sm:$0xff]  ;;  %v1120_v21 = vld [vmem:[%s1641_s0 + $0xa0] sm:$0xff]  ;;  %v1121_v25 = vld [vmem:[%s1641_s0 + $0xa8] sm:$0xff] }
   0x9   :  { %v1127_v18 = vld [vmem:[%s1641_s0 + $0xd8] sm:$0xff]  ;;  %v1128_v22 = vld [vmem:[%s1641_s0 + $0xe0] sm:$0xff]  ;;  %v1129_v26 = vld [vmem:[%s1641_s0 + $0xe8] sm:$0xff] }
   0xa   :  { %370 = vmatpush.bf16.msra.mxu0 %v1132_v2  ;;  %1141 = vmatpush.bf16.msra.mxu1 %v1132_v2  ;;  %v1106_v27 = vld [vmem:[%s1641_s0 + $0x30] sm:$0xff]  ;;  %v1107_v31 = vld [vmem:[%s1641_s0 + $0x38] sm:$0xff]  ;;  %v1311_v35 = vld [vmem:[%s1639_s2] ss:$0 sm:$0xff] }
   0xb   :  { %1142 = vmatpush.bf16.msra.mxu2 %v1132_v2  ;;  %1143 = vmatpush.bf16.msra.mxu3 %v1132_v2  ;;  %v1114_v28 = vld [vmem:[%s1641_s0 + $0x70] sm:$0xff]  ;;  %v1115_v32 = vld [vmem:[%s1641_s0 + $0x78] sm:$0xff]  ;;  %v1316_v36 = vld [vmem:[%s1640_s3] ss:$0 sm:$0xff] }
   0xc   :  { %v1122_v29 = vld [vmem:[%s1641_s0 + $0xb0] sm:$0xff]  ;;  %v1123_v33 = vld [vmem:[%s1641_s0 + $0xb8] sm:$0xff] }
   0xd   :  { %1068 = vmatmul.msk.bf16.vlgmr.msra.gmra.mxu0 %vm266_vm0, %v1100_v3  ;;  %1076 = vmatmul.msk.bf16.vlgmr.msra.gmra.mxu1 %vm266_vm0, %v1108_v4  ;;  %v1130_v30 = vld [vmem:[%s1641_s0 + $0xf0] sm:$0xff]  ;;  %v1131_v34 = vld [vmem:[%s1641_s0 + $0xf8] sm:$0xff] }
   0xe   :  { %1084 = vmatmul.msk.bf16.vlgmr.msra.gmra.mxu2 %vm266_vm0, %v1116_v5  ;;  %1092 = vmatmul.msk.bf16.vlgmr.msra.gmra.mxu3 %vm266_vm0, %v1124_v6 }
  0x1d   :  { %1069 = vmatmul.msk.bf16.gmra.mxu0 %vm266_vm0, %v1101_v7  ;;  %1077 = vmatmul.msk.bf16.gmra.mxu1 %vm266_vm0, %v1109_v8 }
  0x1e   :  { %1085 = vmatmul.msk.bf16.gmra.mxu2 %vm266_vm0, %v1117_v9  ;;  %1093 = vmatmul.msk.bf16.gmra.mxu3 %vm266_vm0, %v1125_v10 }
  0x2d   :  { %1070 = vmatmul.msk.bf16.gmra.mxu0 %vm266_vm0, %v1102_v11  ;;  %1078 = vmatmul.msk.bf16.gmra.mxu1 %vm266_vm0, %v1110_v12 }
  0x2e   :  { %1086 = vmatmul.msk.bf16.gmra.mxu2 %vm266_vm0, %v1118_v13  ;;  %1094 = vmatmul.msk.bf16.gmra.mxu3 %vm266_vm0, %v1126_v14 }
  0x3d   :  { %1071 = vmatmul.msk.bf16.gmra.mxu0 %vm266_vm0, %v1103_v15  ;;  %1079 = vmatmul.msk.bf16.gmra.mxu1 %vm266_vm0, %v1111_v16 }
  0x3e   :  { %1087 = vmatmul.msk.bf16.gmra.mxu2 %vm266_vm0, %v1119_v17  ;;  %1095 = vmatmul.msk.bf16.gmra.mxu3 %vm266_vm0, %v1127_v18 }
  0x4d   :  { %1072 = vmatmul.msk.bf16.gmra.mxu0 %vm266_vm0, %v1104_v19  ;;  %1080 = vmatmul.msk.bf16.gmra.mxu1 %vm266_vm0, %v1112_v20 }
  0x4e   :  { %1088 = vmatmul.msk.bf16.gmra.mxu2 %vm266_vm0, %v1120_v21  ;;  %1096 = vmatmul.msk.bf16.gmra.mxu3 %vm266_vm0, %v1128_v22 }
  0x5d   :  { %1073 = vmatmul.msk.bf16.gmra.mxu0 %vm266_vm0, %v1105_v23  ;;  %1081 = vmatmul.msk.bf16.gmra.mxu1 %vm266_vm0, %v1113_v24 }
  0x5e   :  { %1089 = vmatmul.msk.bf16.gmra.mxu2 %vm266_vm0, %v1121_v25  ;;  %1097 = vmatmul.msk.bf16.gmra.mxu3 %vm266_vm0, %v1129_v26 }
  0x6d   :  { %1074 = vmatmul.msk.bf16.gmra.mxu0 %vm266_vm0, %v1106_v27  ;;  %1082 = vmatmul.msk.bf16.gmra.mxu1 %vm266_vm0, %v1114_v28 }
  0x6e   :  { %1090 = vmatmul.msk.bf16.gmra.mxu2 %vm266_vm0, %v1122_v29  ;;  %1098 = vmatmul.msk.bf16.gmra.mxu3 %vm266_vm0, %v1130_v30 }
  0x7d   :  { %1075 = vmatmul.msk.bf16.gmra.mxu0 %vm266_vm0, %v1107_v31  ;;  %1083 = vmatmul.msk.bf16.gmra.mxu1 %vm266_vm0, %v1115_v32 }
  0x7e   :  { %1091 = vmatmul.msk.bf16.gmra.mxu2 %vm266_vm0, %v1123_v33  ;;  %1099 = vmatmul.msk.bf16.gmra.mxu3 %vm266_vm0, %v1131_v34 }
  0x8a   :  { %v372_v37 = vpop.f32.mrf.mxu0  ;;  %v412_v38 = vpop.f32.mrf.mxu1 }
  0x8b   :  { %v536_v39 = vmul.f32 %v1311_v35, %v372_v37  ;;  %v552_v40 = vmul.f32 %v1311_v35, %v412_v38 }
  0x8d   :  { %v604_v41 = vadd.f32 %v1316_v36, %v536_v39  ;;  %v620_v42 = vadd.f32 %v1316_v36, %v552_v40 }
  0x8f   :  { %vm668_vm1 = vcmp.ge.f32.partialorder %v604_v41, 0.0  ;;  %v732_v43 = vmul.f32 0.2, %v604_v41  ;;  %vm684_vm2 = vcmp.ge.f32.partialorder %v620_v42, 0.0  ;;  %v748_v44 = vmul.f32 0.2, %v620_v42 }
  0x91   :  { %v796_v45 = vsel %vm668_vm1, %v604_v41, %v732_v43  ;;  %v812_v46 = vsel %vm684_vm2, %v620_v42, %v748_v44  ;;  %v452_v47 = vpop.f32.mrf.mxu2  ;;  %v492_v48 = vpop.f32.mrf.mxu3 }
  0x92   :  { %860 = vst [vmem:[%s1642_s4] sm:$0xff] %v796_v45  ;;  %v568_v49 = vmul.f32 %v1311_v35, %v452_v47  ;;  %v584_v50 = vmul.f32 %v1311_v35, %v492_v48  ;;  %v374_v51 = vpop.f32.mrf.mxu0  ;;  %v414_v52 = vpop.f32.mrf.mxu1 }
  0x93   :  { %876 = vst [vmem:[%s1642_s4 + $0x80] sm:$0xff] %v812_v46  ;;  %v537_v53 = vmul.f32 %v1311_v35, %v374_v51  ;;  %v553_v54 = vmul.f32 %v1311_v35, %v414_v52 }
  0x94   :  { %v636_v55 = vadd.f32 %v1316_v36, %v568_v49  ;;  %v652_v56 = vadd.f32 %v1316_v36, %v584_v50 }
  0x95   :  { %v605_v57 = vadd.f32 %v1316_v36, %v537_v53  ;;  %v621_v58 = vadd.f32 %v1316_v36, %v553_v54 }
  0x96   :  { %vm700_vm3 = vcmp.ge.f32.partialorder %v636_v55, 0.0  ;;  %v764_v59 = vmul.f32 0.2, %v636_v55  ;;  %vm716_vm4 = vcmp.ge.f32.partialorder %v652_v56, 0.0  ;;  %v780_v60 = vmul.f32 0.2, %v652_v56 }
  0x97   :  { %vm669_vm5 = vcmp.ge.f32.partialorder %v605_v57, 0.0  ;;  %v733_v61 = vmul.f32 0.2, %v605_v57  ;;  %vm685_vm6 = vcmp.ge.f32.partialorder %v621_v58, 0.0  ;;  %v749_v62 = vmul.f32 0.2, %v621_v58 }
  0x98   :  { %v828_v63 = vsel %vm700_vm3, %v636_v55, %v764_v59  ;;  %v844_v0 = vsel %vm716_vm4, %v652_v56, %v780_v60 }
  0x99   :  { %892 = vst [vmem:[%s1642_s4 + $0x100] sm:$0xff] %v828_v63  ;;  %v797_v1 = vsel %vm669_vm5, %v605_v57, %v733_v61  ;;  %v813_v2 = vsel %vm685_vm6, %v621_v58, %v749_v62  ;;  %v454_v3 = vpop.f32.mrf.mxu2  ;;  %v494_v4 = vpop.f32.mrf.mxu3 }
  0x9a   :  { %908 = vst [vmem:[%s1642_s4 + $0x180] sm:$0xff] %v844_v0  ;;  %v569_v5 = vmul.f32 %v1311_v35, %v454_v3  ;;  %v585_v6 = vmul.f32 %v1311_v35, %v494_v4  ;;  %v377_v7 = vpop.f32.mrf.mxu0  ;;  %v417_v8 = vpop.f32.mrf.mxu1 }
  0x9b   :  { %861 = vst [vmem:[%s1642_s4 + $0x8] sm:$0xff] %v797_v1  ;;  %v538_v9 = vmul.f32 %v1311_v35, %v377_v7  ;;  %v554_v10 = vmul.f32 %v1311_v35, %v417_v8 }
  0x9c   :  { %877 = vst [vmem:[%s1642_s4 + $0x88] sm:$0xff] %v813_v2  ;;  %v637_v11 = vadd.f32 %v1316_v36, %v569_v5  ;;  %v653_v12 = vadd.f32 %v1316_v36, %v585_v6 }
  0x9d   :  { %v606_v13 = vadd.f32 %v1316_v36, %v538_v9  ;;  %v622_v14 = vadd.f32 %v1316_v36, %v554_v10 }
  0x9e   :  { %vm701_vm7 = vcmp.ge.f32.partialorder %v637_v11, 0.0  ;;  %v765_v15 = vmul.f32 0.2, %v637_v11  ;;  %vm717_vm8 = vcmp.ge.f32.partialorder %v653_v12, 0.0  ;;  %v781_v16 = vmul.f32 0.2, %v653_v12 }
  0x9f   :  { %vm670_vm9 = vcmp.ge.f32.partialorder %v606_v13, 0.0  ;;  %v734_v17 = vmul.f32 0.2, %v606_v13  ;;  %vm686_vm10 = vcmp.ge.f32.partialorder %v622_v14, 0.0  ;;  %v750_v18 = vmul.f32 0.2, %v622_v14 }
  0xa0   :  { %v829_v19 = vsel %vm701_vm7, %v637_v11, %v765_v15  ;;  %v845_v20 = vsel %vm717_vm8, %v653_v12, %v781_v16 }
  0xa1   :  { %893 = vst [vmem:[%s1642_s4 + $0x108] sm:$0xff] %v829_v19  ;;  %v798_v21 = vsel %vm670_vm9, %v606_v13, %v734_v17  ;;  %v814_v22 = vsel %vm686_vm10, %v622_v14, %v750_v18  ;;  %v457_v23 = vpop.f32.mrf.mxu2  ;;  %v497_v24 = vpop.f32.mrf.mxu3 }
  0xa2   :  { %909 = vst [vmem:[%s1642_s4 + $0x188] sm:$0xff] %v845_v20  ;;  %v570_v25 = vmul.f32 %v1311_v35, %v457_v23  ;;  %v586_v26 = vmul.f32 %v1311_v35, %v497_v24  ;;  %v379_v27 = vpop.f32.mrf.mxu0  ;;  %v419_v28 = vpop.f32.mrf.mxu1 }
  0xa3   :  { %862 = vst [vmem:[%s1642_s4 + $0x10] sm:$0xff] %v798_v21  ;;  %v539_v29 = vmul.f32 %v1311_v35, %v379_v27  ;;  %v555_v30 = vmul.f32 %v1311_v35, %v419_v28 }
  0xa4   :  { %878 = vst [vmem:[%s1642_s4 + $0x90] sm:$0xff] %v814_v22  ;;  %v638_v31 = vadd.f32 %v1316_v36, %v570_v25  ;;  %v654_v32 = vadd.f32 %v1316_v36, %v586_v26 }
  0xa5   :  { %v607_v33 = vadd.f32 %v1316_v36, %v539_v29  ;;  %v623_v34 = vadd.f32 %v1316_v36, %v555_v30 }
  0xa6   :  { %vm702_vm11 = vcmp.ge.f32.partialorder %v638_v31, 0.0  ;;  %v766_v37 = vmul.f32 0.2, %v638_v31  ;;  %vm718_vm12 = vcmp.ge.f32.partialorder %v654_v32, 0.0  ;;  %v782_v38 = vmul.f32 0.2, %v654_v32 }
  0xa7   :  { %vm671_vm13 = vcmp.ge.f32.partialorder %v607_v33, 0.0  ;;  %v735_v39 = vmul.f32 0.2, %v607_v33  ;;  %vm687_vm14 = vcmp.ge.f32.partialorder %v623_v34, 0.0  ;;  %v751_v40 = vmul.f32 0.2, %v623_v34 }
  0xa8   :  { %v830_v41 = vsel %vm702_vm11, %v638_v31, %v766_v37  ;;  %v846_v42 = vsel %vm718_vm12, %v654_v32, %v782_v38 }
  0xa9   :  { %894 = vst [vmem:[%s1642_s4 + $0x110] sm:$0xff] %v830_v41  ;;  %v799_v43 = vsel %vm671_vm13, %v607_v33, %v735_v39  ;;  %v815_v44 = vsel %vm687_vm14, %v623_v34, %v751_v40  ;;  %v459_v45 = vpop.f32.mrf.mxu2  ;;  %v499_v46 = vpop.f32.mrf.mxu3 }
  0xaa   :  { %910 = vst [vmem:[%s1642_s4 + $0x190] sm:$0xff] %v846_v42  ;;  %v571_v47 = vmul.f32 %v1311_v35, %v459_v45  ;;  %v587_v48 = vmul.f32 %v1311_v35, %v499_v46  ;;  %v382_v49 = vpop.f32.mrf.mxu0  ;;  %v422_v50 = vpop.f32.mrf.mxu1 }
  0xab   :  { %863 = vst [vmem:[%s1642_s4 + $0x18] sm:$0xff] %v799_v43  ;;  %v540_v51 = vmul.f32 %v1311_v35, %v382_v49  ;;  %v556_v52 = vmul.f32 %v1311_v35, %v422_v50 }
  0xac   :  { %879 = vst [vmem:[%s1642_s4 + $0x98] sm:$0xff] %v815_v44  ;;  %v639_v53 = vadd.f32 %v1316_v36, %v571_v47  ;;  %v655_v54 = vadd.f32 %v1316_v36, %v587_v48 }
  0xad   :  { %v608_v55 = vadd.f32 %v1316_v36, %v540_v51  ;;  %v624_v56 = vadd.f32 %v1316_v36, %v556_v52 }
  0xae   :  { %vm703_vm15 = vcmp.ge.f32.partialorder %v639_v53, 0.0  ;;  %v767_v57 = vmul.f32 0.2, %v639_v53  ;;  %vm719_vm0 = vcmp.ge.f32.partialorder %v655_v54, 0.0  ;;  %v783_v58 = vmul.f32 0.2, %v655_v54 }
  0xaf   :  { %vm672_vm1 = vcmp.ge.f32.partialorder %v608_v55, 0.0  ;;  %v736_v59 = vmul.f32 0.2, %v608_v55  ;;  %vm688_vm2 = vcmp.ge.f32.partialorder %v624_v56, 0.0  ;;  %v752_v60 = vmul.f32 0.2, %v624_v56 }
  0xb0   :  { %v831_v61 = vsel %vm703_vm15, %v639_v53, %v767_v57  ;;  %v847_v62 = vsel %vm719_vm0, %v655_v54, %v783_v58 }
  0xb1   :  { %895 = vst [vmem:[%s1642_s4 + $0x118] sm:$0xff] %v831_v61  ;;  %v800_v63 = vsel %vm672_vm1, %v608_v55, %v736_v59  ;;  %v816_v0 = vsel %vm688_vm2, %v624_v56, %v752_v60  ;;  %v462_v1 = vpop.f32.mrf.mxu2  ;;  %v502_v2 = vpop.f32.mrf.mxu3 }
  0xb2   :  { %911 = vst [vmem:[%s1642_s4 + $0x198] sm:$0xff] %v847_v62  ;;  %v572_v3 = vmul.f32 %v1311_v35, %v462_v1  ;;  %v588_v4 = vmul.f32 %v1311_v35, %v502_v2  ;;  %v384_v5 = vpop.f32.mrf.mxu0  ;;  %v424_v6 = vpop.f32.mrf.mxu1 }
  0xb3   :  { %864 = vst [vmem:[%s1642_s4 + $0x20] sm:$0xff] %v800_v63  ;;  %v541_v7 = vmul.f32 %v1311_v35, %v384_v5  ;;  %v557_v8 = vmul.f32 %v1311_v35, %v424_v6 }
  0xb4   :  { %880 = vst [vmem:[%s1642_s4 + $0xa0] sm:$0xff] %v816_v0  ;;  %v640_v9 = vadd.f32 %v1316_v36, %v572_v3  ;;  %v656_v10 = vadd.f32 %v1316_v36, %v588_v4 }
  0xb5   :  { %v609_v11 = vadd.f32 %v1316_v36, %v541_v7  ;;  %v625_v12 = vadd.f32 %v1316_v36, %v557_v8 }
  0xb6   :  { %vm704_vm3 = vcmp.ge.f32.partialorder %v640_v9, 0.0  ;;  %v768_v13 = vmul.f32 0.2, %v640_v9  ;;  %vm720_vm4 = vcmp.ge.f32.partialorder %v656_v10, 0.0  ;;  %v784_v14 = vmul.f32 0.2, %v656_v10 }
  0xb7   :  { %vm673_vm5 = vcmp.ge.f32.partialorder %v609_v11, 0.0  ;;  %v737_v15 = vmul.f32 0.2, %v609_v11  ;;  %vm689_vm6 = vcmp.ge.f32.partialorder %v625_v12, 0.0  ;;  %v753_v16 = vmul.f32 0.2, %v625_v12 }
  0xb8   :  { %v832_v17 = vsel %vm704_vm3, %v640_v9, %v768_v13  ;;  %v848_v18 = vsel %vm720_vm4, %v656_v10, %v784_v14 }
  0xb9   :  { %896 = vst [vmem:[%s1642_s4 + $0x120] sm:$0xff] %v832_v17  ;;  %v801_v19 = vsel %vm673_vm5, %v609_v11, %v737_v15  ;;  %v817_v20 = vsel %vm689_vm6, %v625_v12, %v753_v16  ;;  %v464_v21 = vpop.f32.mrf.mxu2  ;;  %v504_v22 = vpop.f32.mrf.mxu3 }
  0xba   :  { %912 = vst [vmem:[%s1642_s4 + $0x1a0] sm:$0xff] %v848_v18  ;;  %v573_v23 = vmul.f32 %v1311_v35, %v464_v21  ;;  %v589_v24 = vmul.f32 %v1311_v35, %v504_v22  ;;  %v387_v25 = vpop.f32.mrf.mxu0  ;;  %v427_v26 = vpop.f32.mrf.mxu1 }
  0xbb   :  { %865 = vst [vmem:[%s1642_s4 + $0x28] sm:$0xff] %v801_v19  ;;  %v542_v27 = vmul.f32 %v1311_v35, %v387_v25  ;;  %v558_v28 = vmul.f32 %v1311_v35, %v427_v26 }
  0xbc   :  { %881 = vst [vmem:[%s1642_s4 + $0xa8] sm:$0xff] %v817_v20  ;;  %v641_v29 = vadd.f32 %v1316_v36, %v573_v23  ;;  %v657_v30 = vadd.f32 %v1316_v36, %v589_v24 }
  0xbd   :  { %v610_v31 = vadd.f32 %v1316_v36, %v542_v27  ;;  %v626_v32 = vadd.f32 %v1316_v36, %v558_v28 }
  0xbe   :  { %vm705_vm7 = vcmp.ge.f32.partialorder %v641_v29, 0.0  ;;  %v769_v33 = vmul.f32 0.2, %v641_v29  ;;  %vm721_vm8 = vcmp.ge.f32.partialorder %v657_v30, 0.0  ;;  %v785_v34 = vmul.f32 0.2, %v657_v30 }
  0xbf   :  { %vm674_vm9 = vcmp.ge.f32.partialorder %v610_v31, 0.0  ;;  %v738_v37 = vmul.f32 0.2, %v610_v31  ;;  %vm690_vm10 = vcmp.ge.f32.partialorder %v626_v32, 0.0  ;;  %v754_v38 = vmul.f32 0.2, %v626_v32 }
  0xc0   :  { %v833_v39 = vsel %vm705_vm7, %v641_v29, %v769_v33  ;;  %v849_v40 = vsel %vm721_vm8, %v657_v30, %v785_v34 }
  0xc1   :  { %897 = vst [vmem:[%s1642_s4 + $0x128] sm:$0xff] %v833_v39  ;;  %v802_v41 = vsel %vm674_vm9, %v610_v31, %v738_v37  ;;  %v818_v42 = vsel %vm690_vm10, %v626_v32, %v754_v38  ;;  %v467_v43 = vpop.f32.mrf.mxu2  ;;  %v507_v44 = vpop.f32.mrf.mxu3 }
  0xc2   :  { %913 = vst [vmem:[%s1642_s4 + $0x1a8] sm:$0xff] %v849_v40  ;;  %v574_v45 = vmul.f32 %v1311_v35, %v467_v43  ;;  %v590_v46 = vmul.f32 %v1311_v35, %v507_v44  ;;  %v389_v47 = vpop.f32.mrf.mxu0  ;;  %v429_v48 = vpop.f32.mrf.mxu1 }
  0xc3   :  { %866 = vst [vmem:[%s1642_s4 + $0x30] sm:$0xff] %v802_v41  ;;  %v543_v49 = vmul.f32 %v1311_v35, %v389_v47  ;;  %v559_v50 = vmul.f32 %v1311_v35, %v429_v48 }
  0xc4   :  { %882 = vst [vmem:[%s1642_s4 + $0xb0] sm:$0xff] %v818_v42  ;;  %v642_v51 = vadd.f32 %v1316_v36, %v574_v45  ;;  %v658_v52 = vadd.f32 %v1316_v36, %v590_v46 }
  0xc5   :  { %v611_v53 = vadd.f32 %v1316_v36, %v543_v49  ;;  %v627_v54 = vadd.f32 %v1316_v36, %v559_v50 }
  0xc6   :  { %vm706_vm11 = vcmp.ge.f32.partialorder %v642_v51, 0.0  ;;  %v770_v55 = vmul.f32 0.2, %v642_v51  ;;  %vm722_vm12 = vcmp.ge.f32.partialorder %v658_v52, 0.0  ;;  %v786_v56 = vmul.f32 0.2, %v658_v52 }
  0xc7   :  { %vm675_vm13 = vcmp.ge.f32.partialorder %v611_v53, 0.0  ;;  %v739_v57 = vmul.f32 0.2, %v611_v53  ;;  %vm691_vm14 = vcmp.ge.f32.partialorder %v627_v54, 0.0  ;;  %v755_v58 = vmul.f32 0.2, %v627_v54 }
  0xc8   :  { %v834_v59 = vsel %vm706_vm11, %v642_v51, %v770_v55  ;;  %v850_v60 = vsel %vm722_vm12, %v658_v52, %v786_v56 }
  0xc9   :  { %898 = vst [vmem:[%s1642_s4 + $0x130] sm:$0xff] %v834_v59  ;;  %v803_v61 = vsel %vm675_vm13, %v611_v53, %v739_v57  ;;  %v819_v62 = vsel %vm691_vm14, %v627_v54, %v755_v58  ;;  %v469_v63 = vpop.f32.mrf.mxu2  ;;  %v509_v0 = vpop.f32.mrf.mxu3 }
  0xca   :  { %914 = vst [vmem:[%s1642_s4 + $0x1b0] sm:$0xff] %v850_v60  ;;  %v575_v1 = vmul.f32 %v1311_v35, %v469_v63  ;;  %v591_v2 = vmul.f32 %v1311_v35, %v509_v0  ;;  %v392_v3 = vpop.f32.mrf.mxu0  ;;  %v432_v4 = vpop.f32.mrf.mxu1 }
  0xcb   :  { %867 = vst [vmem:[%s1642_s4 + $0x38] sm:$0xff] %v803_v61  ;;  %v544_v5 = vmul.f32 %v1311_v35, %v392_v3  ;;  %v560_v6 = vmul.f32 %v1311_v35, %v432_v4 }
  0xcc   :  { %883 = vst [vmem:[%s1642_s4 + $0xb8] sm:$0xff] %v819_v62  ;;  %v643_v7 = vadd.f32 %v1316_v36, %v575_v1  ;;  %v659_v8 = vadd.f32 %v1316_v36, %v591_v2 }
  0xcd   :  { %v612_v9 = vadd.f32 %v1316_v36, %v544_v5  ;;  %v628_v10 = vadd.f32 %v1316_v36, %v560_v6 }
  0xce   :  { %vm707_vm15 = vcmp.ge.f32.partialorder %v643_v7, 0.0  ;;  %v771_v11 = vmul.f32 0.2, %v643_v7  ;;  %vm723_vm0 = vcmp.ge.f32.partialorder %v659_v8, 0.0  ;;  %v787_v12 = vmul.f32 0.2, %v659_v8 }
  0xcf   :  { %vm676_vm1 = vcmp.ge.f32.partialorder %v612_v9, 0.0  ;;  %v740_v13 = vmul.f32 0.2, %v612_v9  ;;  %vm692_vm2 = vcmp.ge.f32.partialorder %v628_v10, 0.0  ;;  %v756_v14 = vmul.f32 0.2, %v628_v10 }
  0xd0   :  { %v835_v15 = vsel %vm707_vm15, %v643_v7, %v771_v11  ;;  %v851_v16 = vsel %vm723_vm0, %v659_v8, %v787_v12 }
  0xd1   :  { %899 = vst [vmem:[%s1642_s4 + $0x138] sm:$0xff] %v835_v15  ;;  %v804_v17 = vsel %vm676_vm1, %v612_v9, %v740_v13  ;;  %v820_v18 = vsel %vm692_vm2, %v628_v10, %v756_v14  ;;  %v472_v19 = vpop.f32.mrf.mxu2  ;;  %v512_v20 = vpop.f32.mrf.mxu3 }
  0xd2   :  { %915 = vst [vmem:[%s1642_s4 + $0x1b8] sm:$0xff] %v851_v16  ;;  %v576_v21 = vmul.f32 %v1311_v35, %v472_v19  ;;  %v592_v22 = vmul.f32 %v1311_v35, %v512_v20  ;;  %v394_v23 = vpop.f32.mrf.mxu0  ;;  %v434_v24 = vpop.f32.mrf.mxu1 }
  0xd3   :  { %868 = vst [vmem:[%s1642_s4 + $0x40] sm:$0xff] %v804_v17  ;;  %v545_v25 = vmul.f32 %v1311_v35, %v394_v23  ;;  %v561_v26 = vmul.f32 %v1311_v35, %v434_v24 }
  0xd4   :  { %884 = vst [vmem:[%s1642_s4 + $0xc0] sm:$0xff] %v820_v18  ;;  %v644_v27 = vadd.f32 %v1316_v36, %v576_v21  ;;  %v660_v28 = vadd.f32 %v1316_v36, %v592_v22 }
  0xd5   :  { %v613_v29 = vadd.f32 %v1316_v36, %v545_v25  ;;  %v629_v30 = vadd.f32 %v1316_v36, %v561_v26 }
  0xd6   :  { %vm708_vm3 = vcmp.ge.f32.partialorder %v644_v27, 0.0  ;;  %v772_v31 = vmul.f32 0.2, %v644_v27  ;;  %vm724_vm4 = vcmp.ge.f32.partialorder %v660_v28, 0.0  ;;  %v788_v32 = vmul.f32 0.2, %v660_v28 }
  0xd7   :  { %vm677_vm5 = vcmp.ge.f32.partialorder %v613_v29, 0.0  ;;  %v741_v33 = vmul.f32 0.2, %v613_v29  ;;  %vm693_vm6 = vcmp.ge.f32.partialorder %v629_v30, 0.0  ;;  %v757_v34 = vmul.f32 0.2, %v629_v30 }
  0xd8   :  { %v836_v37 = vsel %vm708_vm3, %v644_v27, %v772_v31  ;;  %v852_v38 = vsel %vm724_vm4, %v660_v28, %v788_v32 }
  0xd9   :  { %900 = vst [vmem:[%s1642_s4 + $0x140] sm:$0xff] %v836_v37  ;;  %v805_v39 = vsel %vm677_vm5, %v613_v29, %v741_v33  ;;  %v821_v40 = vsel %vm693_vm6, %v629_v30, %v757_v34  ;;  %v474_v41 = vpop.f32.mrf.mxu2  ;;  %v514_v42 = vpop.f32.mrf.mxu3 }
  0xda   :  { %916 = vst [vmem:[%s1642_s4 + $0x1c0] sm:$0xff] %v852_v38  ;;  %v577_v43 = vmul.f32 %v1311_v35, %v474_v41  ;;  %v593_v44 = vmul.f32 %v1311_v35, %v514_v42  ;;  %v397_v45 = vpop.f32.mrf.mxu0  ;;  %v437_v46 = vpop.f32.mrf.mxu1 }
  0xdb   :  { %869 = vst [vmem:[%s1642_s4 + $0x48] sm:$0xff] %v805_v39  ;;  %v546_v47 = vmul.f32 %v1311_v35, %v397_v45  ;;  %v562_v48 = vmul.f32 %v1311_v35, %v437_v46 }
  0xdc   :  { %885 = vst [vmem:[%s1642_s4 + $0xc8] sm:$0xff] %v821_v40  ;;  %v645_v49 = vadd.f32 %v1316_v36, %v577_v43  ;;  %v661_v50 = vadd.f32 %v1316_v36, %v593_v44 }
  0xdd   :  { %v614_v51 = vadd.f32 %v1316_v36, %v546_v47  ;;  %v630_v52 = vadd.f32 %v1316_v36, %v562_v48 }
  0xde   :  { %vm709_vm7 = vcmp.ge.f32.partialorder %v645_v49, 0.0  ;;  %v773_v53 = vmul.f32 0.2, %v645_v49  ;;  %vm725_vm8 = vcmp.ge.f32.partialorder %v661_v50, 0.0  ;;  %v789_v54 = vmul.f32 0.2, %v661_v50 }
  0xdf   :  { %vm678_vm9 = vcmp.ge.f32.partialorder %v614_v51, 0.0  ;;  %v742_v55 = vmul.f32 0.2, %v614_v51  ;;  %vm694_vm10 = vcmp.ge.f32.partialorder %v630_v52, 0.0  ;;  %v758_v56 = vmul.f32 0.2, %v630_v52 }
  0xe0   :  { %v837_v57 = vsel %vm709_vm7, %v645_v49, %v773_v53  ;;  %v853_v58 = vsel %vm725_vm8, %v661_v50, %v789_v54 }
  0xe1   :  { %901 = vst [vmem:[%s1642_s4 + $0x148] sm:$0xff] %v837_v57  ;;  %v806_v59 = vsel %vm678_vm9, %v614_v51, %v742_v55  ;;  %v822_v60 = vsel %vm694_vm10, %v630_v52, %v758_v56  ;;  %v477_v61 = vpop.f32.mrf.mxu2  ;;  %v517_v62 = vpop.f32.mrf.mxu3 }
  0xe2   :  { %917 = vst [vmem:[%s1642_s4 + $0x1c8] sm:$0xff] %v853_v58  ;;  %v578_v63 = vmul.f32 %v1311_v35, %v477_v61  ;;  %v594_v0 = vmul.f32 %v1311_v35, %v517_v62  ;;  %v399_v1 = vpop.f32.mrf.mxu0  ;;  %v439_v2 = vpop.f32.mrf.mxu1 }
  0xe3   :  { %870 = vst [vmem:[%s1642_s4 + $0x50] sm:$0xff] %v806_v59  ;;  %v547_v3 = vmul.f32 %v1311_v35, %v399_v1  ;;  %v563_v4 = vmul.f32 %v1311_v35, %v439_v2 }
  0xe4   :  { %886 = vst [vmem:[%s1642_s4 + $0xd0] sm:$0xff] %v822_v60  ;;  %v646_v5 = vadd.f32 %v1316_v36, %v578_v63  ;;  %v662_v6 = vadd.f32 %v1316_v36, %v594_v0 }
  0xe5   :  { %v615_v7 = vadd.f32 %v1316_v36, %v547_v3  ;;  %v631_v8 = vadd.f32 %v1316_v36, %v563_v4 }
  0xe6   :  { %vm710_vm11 = vcmp.ge.f32.partialorder %v646_v5, 0.0  ;;  %v774_v9 = vmul.f32 0.2, %v646_v5  ;;  %vm726_vm12 = vcmp.ge.f32.partialorder %v662_v6, 0.0  ;;  %v790_v10 = vmul.f32 0.2, %v662_v6 }
  0xe7   :  { %vm679_vm13 = vcmp.ge.f32.partialorder %v615_v7, 0.0  ;;  %v743_v11 = vmul.f32 0.2, %v615_v7  ;;  %vm695_vm14 = vcmp.ge.f32.partialorder %v631_v8, 0.0  ;;  %v759_v12 = vmul.f32 0.2, %v631_v8 }
  0xe8   :  { %v838_v13 = vsel %vm710_vm11, %v646_v5, %v774_v9  ;;  %v854_v14 = vsel %vm726_vm12, %v662_v6, %v790_v10 }
  0xe9   :  { %902 = vst [vmem:[%s1642_s4 + $0x150] sm:$0xff] %v838_v13  ;;  %v807_v15 = vsel %vm679_vm13, %v615_v7, %v743_v11  ;;  %v823_v16 = vsel %vm695_vm14, %v631_v8, %v759_v12  ;;  %v479_v17 = vpop.f32.mrf.mxu2  ;;  %v519_v18 = vpop.f32.mrf.mxu3 }
  0xea   :  { %918 = vst [vmem:[%s1642_s4 + $0x1d0] sm:$0xff] %v854_v14  ;;  %v579_v19 = vmul.f32 %v1311_v35, %v479_v17  ;;  %v595_v20 = vmul.f32 %v1311_v35, %v519_v18  ;;  %v402_v21 = vpop.f32.mrf.mxu0  ;;  %v442_v22 = vpop.f32.mrf.mxu1 }
  0xeb   :  { %871 = vst [vmem:[%s1642_s4 + $0x58] sm:$0xff] %v807_v15  ;;  %v548_v23 = vmul.f32 %v1311_v35, %v402_v21  ;;  %v564_v24 = vmul.f32 %v1311_v35, %v442_v22 }
  0xec   :  { %887 = vst [vmem:[%s1642_s4 + $0xd8] sm:$0xff] %v823_v16  ;;  %v647_v25 = vadd.f32 %v1316_v36, %v579_v19  ;;  %v663_v26 = vadd.f32 %v1316_v36, %v595_v20 }
  0xed   :  { %v616_v27 = vadd.f32 %v1316_v36, %v548_v23  ;;  %v632_v28 = vadd.f32 %v1316_v36, %v564_v24 }
  0xee   :  { %vm711_vm15 = vcmp.ge.f32.partialorder %v647_v25, 0.0  ;;  %v775_v29 = vmul.f32 0.2, %v647_v25  ;;  %vm727_vm0 = vcmp.ge.f32.partialorder %v663_v26, 0.0  ;;  %v791_v30 = vmul.f32 0.2, %v663_v26 }
  0xef   :  { %vm680_vm1 = vcmp.ge.f32.partialorder %v616_v27, 0.0  ;;  %v744_v31 = vmul.f32 0.2, %v616_v27  ;;  %vm696_vm2 = vcmp.ge.f32.partialorder %v632_v28, 0.0  ;;  %v760_v32 = vmul.f32 0.2, %v632_v28 }
  0xf0   :  { %v839_v33 = vsel %vm711_vm15, %v647_v25, %v775_v29  ;;  %v855_v34 = vsel %vm727_vm0, %v663_v26, %v791_v30 }
  0xf1   :  { %903 = vst [vmem:[%s1642_s4 + $0x158] sm:$0xff] %v839_v33  ;;  %v808_v37 = vsel %vm680_vm1, %v616_v27, %v744_v31  ;;  %v824_v38 = vsel %vm696_vm2, %v632_v28, %v760_v32  ;;  %v482_v39 = vpop.f32.mrf.mxu2  ;;  %v522_v40 = vpop.f32.mrf.mxu3 }
  0xf2   :  { %919 = vst [vmem:[%s1642_s4 + $0x1d8] sm:$0xff] %v855_v34  ;;  %v580_v41 = vmul.f32 %v1311_v35, %v482_v39  ;;  %v596_v42 = vmul.f32 %v1311_v35, %v522_v40  ;;  %v404_v43 = vpop.f32.mrf.mxu0  ;;  %v444_v44 = vpop.f32.mrf.mxu1 }
  0xf3   :  { %872 = vst [vmem:[%s1642_s4 + $0x60] sm:$0xff] %v808_v37  ;;  %v549_v45 = vmul.f32 %v1311_v35, %v404_v43  ;;  %v565_v46 = vmul.f32 %v1311_v35, %v444_v44 }
  0xf4   :  { %888 = vst [vmem:[%s1642_s4 + $0xe0] sm:$0xff] %v824_v38  ;;  %v648_v47 = vadd.f32 %v1316_v36, %v580_v41  ;;  %v664_v48 = vadd.f32 %v1316_v36, %v596_v42 }
  0xf5   :  { %v617_v49 = vadd.f32 %v1316_v36, %v549_v45  ;;  %v633_v50 = vadd.f32 %v1316_v36, %v565_v46 }
  0xf6   :  { %vm712_vm3 = vcmp.ge.f32.partialorder %v648_v47, 0.0  ;;  %v776_v51 = vmul.f32 0.2, %v648_v47  ;;  %vm728_vm4 = vcmp.ge.f32.partialorder %v664_v48, 0.0  ;;  %v792_v52 = vmul.f32 0.2, %v664_v48 }
  0xf7   :  { %vm681_vm5 = vcmp.ge.f32.partialorder %v617_v49, 0.0  ;;  %v745_v53 = vmul.f32 0.2, %v617_v49  ;;  %vm697_vm6 = vcmp.ge.f32.partialorder %v633_v50, 0.0  ;;  %v761_v54 = vmul.f32 0.2, %v633_v50 }
  0xf8   :  { %v840_v55 = vsel %vm712_vm3, %v648_v47, %v776_v51  ;;  %v856_v56 = vsel %vm728_vm4, %v664_v48, %v792_v52 }
  0xf9   :  { %904 = vst [vmem:[%s1642_s4 + $0x160] sm:$0xff] %v840_v55  ;;  %v809_v57 = vsel %vm681_vm5, %v617_v49, %v745_v53  ;;  %v825_v58 = vsel %vm697_vm6, %v633_v50, %v761_v54  ;;  %v484_v59 = vpop.f32.mrf.mxu2  ;;  %v524_v60 = vpop.f32.mrf.mxu3 }
  0xfa   :  { %920 = vst [vmem:[%s1642_s4 + $0x1e0] sm:$0xff] %v856_v56  ;;  %v581_v61 = vmul.f32 %v1311_v35, %v484_v59  ;;  %v597_v62 = vmul.f32 %v1311_v35, %v524_v60  ;;  %v407_v63 = vpop.f32.mrf.mxu0  ;;  %v447_v0 = vpop.f32.mrf.mxu1 }
  0xfb   :  { %873 = vst [vmem:[%s1642_s4 + $0x68] sm:$0xff] %v809_v57  ;;  %v550_v1 = vmul.f32 %v1311_v35, %v407_v63  ;;  %v566_v2 = vmul.f32 %v1311_v35, %v447_v0 }
  0xfc   :  { %889 = vst [vmem:[%s1642_s4 + $0xe8] sm:$0xff] %v825_v58  ;;  %v649_v3 = vadd.f32 %v1316_v36, %v581_v61  ;;  %v665_v4 = vadd.f32 %v1316_v36, %v597_v62 }
  0xfd   :  { %v618_v5 = vadd.f32 %v1316_v36, %v550_v1  ;;  %v634_v6 = vadd.f32 %v1316_v36, %v566_v2 }
  0xfe   :  { %vm713_vm7 = vcmp.ge.f32.partialorder %v649_v3, 0.0  ;;  %v777_v7 = vmul.f32 0.2, %v649_v3  ;;  %vm729_vm8 = vcmp.ge.f32.partialorder %v665_v4, 0.0  ;;  %v793_v8 = vmul.f32 0.2, %v665_v4 }
  0xff   :  { %vm682_vm9 = vcmp.ge.f32.partialorder %v618_v5, 0.0  ;;  %v746_v9 = vmul.f32 0.2, %v618_v5  ;;  %vm698_vm10 = vcmp.ge.f32.partialorder %v634_v6, 0.0  ;;  %v762_v10 = vmul.f32 0.2, %v634_v6 }
 0x100   :  { %v841_v11 = vsel %vm713_vm7, %v649_v3, %v777_v7  ;;  %v857_v12 = vsel %vm729_vm8, %v665_v4, %v793_v8 }
 0x101   :  { %905 = vst [vmem:[%s1642_s4 + $0x168] sm:$0xff] %v841_v11  ;;  %v810_v13 = vsel %vm682_vm9, %v618_v5, %v746_v9  ;;  %v826_v14 = vsel %vm698_vm10, %v634_v6, %v762_v10  ;;  %v487_v15 = vpop.f32.mrf.mxu2  ;;  %v527_v16 = vpop.f32.mrf.mxu3 }
 0x102   :  { %921 = vst [vmem:[%s1642_s4 + $0x1e8] sm:$0xff] %v857_v12  ;;  %v582_v17 = vmul.f32 %v1311_v35, %v487_v15  ;;  %v598_v18 = vmul.f32 %v1311_v35, %v527_v16  ;;  %v409_v19 = vpop.f32.mrf.mxu0  ;;  %v449_v20 = vpop.f32.mrf.mxu1 }
 0x103   :  { %874 = vst [vmem:[%s1642_s4 + $0x70] sm:$0xff] %v810_v13  ;;  %v551_v21 = vmul.f32 %v1311_v35, %v409_v19  ;;  %v567_v22 = vmul.f32 %v1311_v35, %v449_v20 }
 0x104   :  { %890 = vst [vmem:[%s1642_s4 + $0xf0] sm:$0xff] %v826_v14  ;;  %v650_v23 = vadd.f32 %v1316_v36, %v582_v17  ;;  %v666_v24 = vadd.f32 %v1316_v36, %v598_v18 }
 0x105   :  { %v619_v25 = vadd.f32 %v1316_v36, %v551_v21  ;;  %v635_v26 = vadd.f32 %v1316_v36, %v567_v22 }
 0x106   :  { %vm714_vm11 = vcmp.ge.f32.partialorder %v650_v23, 0.0  ;;  %v778_v27 = vmul.f32 0.2, %v650_v23  ;;  %vm730_vm12 = vcmp.ge.f32.partialorder %v666_v24, 0.0  ;;  %v794_v28 = vmul.f32 0.2, %v666_v24 }
 0x107   :  { %vm683_vm13 = vcmp.ge.f32.partialorder %v619_v25, 0.0  ;;  %v747_v29 = vmul.f32 0.2, %v619_v25  ;;  %vm699_vm14 = vcmp.ge.f32.partialorder %v635_v26, 0.0  ;;  %v763_v30 = vmul.f32 0.2, %v635_v26 }
 0x108   :  { %v842_v31 = vsel %vm714_vm11, %v650_v23, %v778_v27  ;;  %v858_v32 = vsel %vm730_vm12, %v666_v24, %v794_v28 }
 0x109   :  { %906 = vst [vmem:[%s1642_s4 + $0x170] sm:$0xff] %v842_v31  ;;  %v811_v33 = vsel %vm683_vm13, %v619_v25, %v747_v29  ;;  %v827_v34 = vsel %vm699_vm14, %v635_v26, %v763_v30  ;;  %v489_v37 = vpop.f32.mrf.mxu2  ;;  %v529_v38 = vpop.f32.mrf.mxu3 }
 0x10a   :  { %922 = vst [vmem:[%s1642_s4 + $0x1f0] sm:$0xff] %v858_v32  ;;  %v583_v39 = vmul.f32 %v1311_v35, %v489_v37  ;;  %v599_v40 = vmul.f32 %v1311_v35, %v529_v38 }
 0x10b   :  { %875 = vst [vmem:[%s1642_s4 + $0x78] sm:$0xff] %v811_v33 }
 0x10c   :  { %891 = vst [vmem:[%s1642_s4 + $0xf8] sm:$0xff] %v827_v34  ;;  %v651_v41 = vadd.f32 %v1316_v36, %v583_v39  ;;  %v667_v42 = vadd.f32 %v1316_v36, %v599_v40 }
 0x10e   :  { %vm715_vm15 = vcmp.ge.f32.partialorder %v651_v41, 0.0  ;;  %v779_v43 = vmul.f32 0.2, %v651_v41  ;;  %vm731_vm0 = vcmp.ge.f32.partialorder %v667_v42, 0.0  ;;  %v795_v44 = vmul.f32 0.2, %v667_v42 }
 0x110   :  { %v843_v45 = vsel %vm715_vm15, %v651_v41, %v779_v43  ;;  %v859_v46 = vsel %vm731_vm0, %v667_v42, %v795_v44 }
 0x111   :  { %907 = vst [vmem:[%s1642_s4 + $0x178] sm:$0xff] %v843_v45 }
 0x112   :  { %923 = vst [vmem:[%s1642_s4 + $0x1f8] sm:$0xff] %v859_v46 }

</bundles_post_ra>
